<compile_context>
chip_gen: v6e
topology: v6e:2x2x1
jax: 0.10.0
libtpu: 0.0.40
codegen_flags: <defaults>
</compile_context>

<pallas_src>
import functools

import jax
import jax.numpy as jnp
from jax.experimental import pallas as pl
from jax.experimental.pallas import tpu as pltpu

LANE = 128          # vreg lane width
SUBLANE = 8         # vreg sublane count


# ----------------------------------------------------------------------------
# small helpers
# ----------------------------------------------------------------------------
def _round_up(n, m):
    return ((n + m - 1) // m) * m


def _pad_to(x, shape):
    pads = [(0, t - s) for s, t in zip(x.shape, shape)]
    return jnp.pad(x, pads)


def _full_spec(shape):
    return pl.BlockSpec(shape, lambda: tuple(0 for _ in shape))


def _pick_vmem_limit_bytes():
    """~3/4 of physical VMEM (96 MiB on v5e/v6e, 48 MiB on v7x); safe fallback."""
    cap = 64 * 1024 * 1024
    try:
        cap = int(getattr(pltpu.get_tpu_info(), "vmem_capacity_bytes", cap))
    except Exception:
        pass
    return max(32 * 1024 * 1024, min(100 * 1024 * 1024, (cap * 3) // 4))


# ----------------------------------------------------------------------------
# fused forward kernel
# ----------------------------------------------------------------------------
def _fused_taxorel_kernel(
        # adjacency (mean-normalized, dense, zero node-padded)
        a_in_s_ref, a_out_s_ref, a_in_o_ref, a_out_o_ref,
        # host-stacked node features [x_subj ; x_obj]  (2Np, Dp)
        x_stack_ref,
        # per-graph mean-readout matrices (Bp, Np)
        readout_s_ref, readout_o_ref,
        # relation token embeddings (Bp, Dp)
        rel_x_ref,
        # CompGCN params (0.5 factors folded in, zero-padded on host)
        w1_cat_ref, b1_ref,                 # (Dp, 2Hp), (1, Hp)
        w2_o_ref, w2_i_ref, b2_ref,         # (Hp, Dp), (Hp, Dp), (1, Dp)
        # rel-encoder params (zero-padded on host)
        wr1_ref, br1_ref, wr2_ref, br2_ref,
        # negative-sampling one-hot selection matrices (Bp, Bp), always f32
        sel_h_ref, sel_t_ref,
        # outputs: lane-dense score slabs (Bp, 128)
        pos_ref, neg_ref,
        *, n_pad: int, hid_p: int, b_pad: int, norm: int, use_bf16: bool):

    cdt = jnp.bfloat16 if use_bf16 else jnp.float32

    def mm(a, b):
        # operands already in `cdt` when they come from HBM (host-cast);
        # only in-kernel intermediates pay a cast on the bf16 path.
        return jnp.dot(a.astype(cdt), b.astype(cdt),
                       preferred_element_type=jnp.float32)

    # weights read (and, on the bf16 path, cast) ONCE
    w1_cat = w1_cat_ref[...]
    b1 = b1_ref[...]
    w2_o = w2_o_ref[...]
    w2_i = w2_i_ref[...]
    b2 = b2_ref[...]

    # layer-1 weight-side matmul shared by both graphs: (2Np, Dp) @ (Dp, 2Hp)
    xw = mm(x_stack_ref[...], w1_cat)                       # (2Np, 2Hp) f32

    def graph_emb(a_in, a_out, readout, row0):
        # static, tile-aligned slices (row0 multiple of 8, hid_p multiple of 128)
        xw_o = xw[row0:row0 + n_pad, :hid_p]                 # x @ 0.5*W_O1
        xw_i = xw[row0:row0 + n_pad, hid_p:]                 # x @ 0.5*W_I1
        # ---- layer 1 (D -> D/4): two aggregation matmuls + VPU add ----------
        h1 = jnp.maximum(mm(a_in, xw_o) + mm(a_out, xw_i) + b1, 0.0)  # (Np,Hp)
        # ---- layer 2 (D/4 -> D): aggregate first (narrow), then weights -----
        agg_in = mm(a_in, h1)                                # (Np, Hp)
        agg_out = mm(a_out, h1)                              # (Np, Hp)
        h2 = mm(agg_in, w2_o) + mm(agg_out, w2_i) + b2       # (Np, Dp)
        # ---- per-graph mean readout ------------------------------------------
        return mm(readout, h2)                               # (Bp, Dp) f32

    h_embs = graph_emb(a_in_s_ref[...], a_out_s_ref[...], readout_s_ref[...], 0)
    t_embs = graph_emb(a_in_o_ref[...], a_out_o_ref[...], readout_o_ref[...],
                       n_pad)

    # rel_encoder: Linear -> ReLU -> Linear
    r = jnp.maximum(mm(rel_x_ref[...], wr1_ref[...]) + br1_ref[...], 0.0)
    r_embs = mm(r, wr2_ref[...]) + br2_ref[...]               # (Bp, Dp) f32

    # negative triples via one-hot selection matmuls (kept in f32 for exactness)
    corrupt_h = jnp.dot(sel_h_ref[...], h_embs, preferred_element_type=jnp.float32)
    corrupt_t = jnp.dot(sel_t_ref[...], t_embs, preferred_element_type=jnp.float32)

    # TransE distances (pos / neg computed and stored separately: no concat)
    d_pos = h_embs + r_embs - t_embs                          # (Bp, Dp)
    d_neg = corrupt_h + r_embs - corrupt_t                    # (Bp, Dp)

    if norm == 1:
        s_pos = jnp.sum(jnp.abs(d_pos), axis=1, keepdims=True)
        s_neg = jnp.sum(jnp.abs(d_neg), axis=1, keepdims=True)
    else:  # norm == 2; padded lanes are exactly zero and contribute nothing
        s_pos = jnp.sqrt(jnp.sum(d_pos * d_pos, axis=1, keepdims=True))
        s_neg = jnp.sqrt(jnp.sum(d_neg * d_neg, axis=1, keepdims=True))

    # lane-dense, sublane-padded stores (full unmasked (8,128) tiles)
    pos_ref[...] = jnp.broadcast_to(s_pos, (b_pad, LANE))
    neg_ref[...] = jnp.broadcast_to(s_neg, (b_pad, LANE))


# ----------------------------------------------------------------------------
# parameter init (matches nn.Linear default init, f32)
# ----------------------------------------------------------------------------
def init_linear(key, d_in, d_out):
    kw, kb = jax.random.split(key)
    bound = 1.0 / jnp.sqrt(jnp.float32(d_in))
    w = jax.random.uniform(kw, (d_in, d_out), jnp.float32, -bound, bound)
    b = jax.random.uniform(kb, (1, d_out), jnp.float32, -bound, bound)
    return w, b


def init_params(key, emb_dim):
    hid = emb_dim // 4
    ks = jax.random.split(key, 6)
    p = {}
    p["gnn1_WO"], p["gnn1_bO"] = init_linear(ks[0], emb_dim, hid)
    p["gnn1_WI"], p["gnn1_bI"] = init_linear(ks[1], emb_dim, hid)
    p["gnn2_WO"], p["gnn2_bO"] = init_linear(ks[2], hid, emb_dim)
    p["gnn2_WI"], p["gnn2_bI"] = init_linear(ks[3], hid, emb_dim)
    p["rel_w1"], p["rel_b1"] = init_linear(ks[4], emb_dim, hid)
    p["rel_w2"], p["rel_b2"] = init_linear(ks[5], hid, emb_dim)
    return p


# ----------------------------------------------------------------------------
# graph preparation: dense mean-normalized adjacencies + mean readout
# (adjacency is produced ONCE per direction; no duplicated a_cat/a_vcat)
# ----------------------------------------------------------------------------
def prepare_batched_graph(edges, num_nodes, node_counts):
    a = jnp.zeros((num_nodes, num_nodes), jnp.float32)
    if edges:
        src = jnp.array([e[0] for e in edges], jnp.int32)
        dst = jnp.array([e[1] for e in edges], jnp.int32)
        a = a.at[src, dst].set(1.0)
    indeg = a.sum(axis=0)
    outdeg = a.sum(axis=1)
    a_in = a.T / jnp.maximum(indeg, 1.0)[:, None]    # row v: mean over in-nbrs  (-> W_O)
    a_out = a / jnp.maximum(outdeg, 1.0)[:, None]    # row v: mean over out-nbrs (-> W_I)

    num_graphs = len(node_counts)
    r = jnp.zeros((num_graphs, num_nodes), jnp.float32)
    start = 0
    for g, nc in enumerate(node_counts):             # g_readout == 'mean'
        r = r.at[g, start:start + nc].set(1.0 / nc)
        start += nc

    # pad node count to a sublane multiple so in-kernel row slices stay aligned;
    # padded nodes have zero adjacency rows/cols and zero readout weight.
    n_pad = _round_up(num_nodes, SUBLANE)
    a_in = _pad_to(a_in, (n_pad, n_pad))
    a_out = _pad_to(a_out, (n_pad, n_pad))
    r = _pad_to(r, (num_graphs, n_pad))
    return a_in, a_out, r


# ----------------------------------------------------------------------------
# forward: one fused pallas_call
# ----------------------------------------------------------------------------
def taxo_rel_olp_forward(params, subj_graph, subj_node_embs, rel_tok_embs,
                         obj_graph, obj_node_embs, neg_key, norm=2,
                         use_bf16_matmul=False):
    if norm not in (1, 2):
        raise ValueError("norm must be 1 or 2")

    # dropout p = 0.0 -> identity (deterministic / eval mode)
    a_in_s, a_out_s, readout_s = subj_graph
    a_in_o, a_out_o, readout_o = obj_graph
    n_pad = a_in_s.shape[0]
    batch = readout_s.shape[0]
    b_pad = _round_up(batch, SUBLANE)

    emb_dim = params["gnn1_WO"].shape[0]
    hid = params["gnn1_WO"].shape[1]
    d_p = _round_up(emb_dim, LANE)      # feature dims padded to lane width
    h_p = _round_up(hid, LANE)

    # --- pack / pad parameters (0.5 factors folded in, biases merged) --------
    w1_cat = jnp.concatenate(
        [_pad_to(0.5 * params["gnn1_WO"], (d_p, h_p)),
         _pad_to(0.5 * params["gnn1_WI"], (d_p, h_p))], axis=1)        # (Dp, 2Hp)
    b1 = _pad_to(0.5 * (params["gnn1_bO"] + params["gnn1_bI"]), (1, h_p))
    w2_o = _pad_to(0.5 * params["gnn2_WO"], (h_p, d_p))
    w2_i = _pad_to(0.5 * params["gnn2_WI"], (h_p, d_p))
    b2 = _pad_to(0.5 * (params["gnn2_bO"] + params["gnn2_bI"]), (1, d_p))
    wr1 = _pad_to(params["rel_w1"], (d_p, h_p))
    br1 = _pad_to(params["rel_b1"], (1, h_p))
    wr2 = _pad_to(params["rel_w2"], (h_p, d_p))
    br2 = _pad_to(params["rel_b2"], (1, d_p))

    # --- pad activations / host-stack the two graphs' node features ----------
    x_stack = jnp.concatenate([_pad_to(subj_node_embs, (n_pad, d_p)),
                               _pad_to(obj_node_embs, (n_pad, d_p))], axis=0)
    rel_x = _pad_to(rel_tok_embs, (b_pad, d_p))
    readout_s_p = _pad_to(readout_s, (b_pad, n_pad))
    readout_o_p = _pad_to(readout_o, (b_pad, n_pad))

    # --- _sample_batch_negative_triples (jax.random substitute for torch) -----
    k1, k2 = jax.random.split(neg_key)
    head_or_tail = jax.random.randint(k1, (batch,), 0, 2)
    random_rows = jax.random.permutation(k2, batch)
    idx = jnp.arange(batch)
    corrupt_hidx = jnp.where(head_or_tail == 1, random_rows, idx)
    corrupt_tidx = jnp.where(head_or_tail == 0, random_rows, idx)
    sel_h = _pad_to(jax.nn.one_hot(corrupt_hidx, batch, dtype=jnp.float32),
                    (b_pad, b_pad))
    sel_t = _pad_to(jax.nn.one_hot(corrupt_tidx, batch, dtype=jnp.float32),
                    (b_pad, b_pad))

    # --- optional bf16 path: cast MXU operands on the HOST (halves DMA bytes);
    #     biases and selection matrices stay f32, accumulation is f32 ----------
    if use_bf16_matmul:
        cast = lambda z: z.astype(jnp.bfloat16)
        (a_in_s, a_out_s, a_in_o, a_out_o, x_stack, readout_s_p, readout_o_p,
         rel_x, w1_cat, w2_o, w2_i, wr1, wr2) = map(
            cast, (a_in_s, a_out_s, a_in_o, a_out_o, x_stack, readout_s_p,
                   readout_o_p, rel_x, w1_cat, w2_o, w2_i, wr1, wr2))

    inputs = (a_in_s, a_out_s, a_in_o, a_out_o,
              x_stack, readout_s_p, readout_o_p, rel_x,
              w1_cat, b1, w2_o, w2_i, b2,
              wr1, br1, wr2, br2, sel_h, sel_t)

    kernel = functools.partial(
        _fused_taxorel_kernel, n_pad=n_pad, hid_p=h_p, b_pad=b_pad,
        norm=norm, use_bf16=use_bf16_matmul)

    out_slab_shape = (b_pad, LANE)
    pos_slab, neg_slab = pl.pallas_call(
        kernel,
        out_shape=(jax.ShapeDtypeStruct(out_slab_shape, jnp.float32),
                   jax.ShapeDtypeStruct(out_slab_shape, jnp.float32)),
        in_specs=[_full_spec(x.shape) for x in inputs],
        out_specs=(_full_spec(out_slab_shape), _full_spec(out_slab_shape)),
        compiler_params=pltpu.CompilerParams(
            vmem_limit_bytes=_pick_vmem_limit_bytes()),
    )(*inputs)

    return pos_slab[:batch, 0], neg_slab[:batch, 0]


# ----------------------------------------------------------------------------
if __name__ == "__main__":
    EMB_DIM = 32          # emb_dim
    BATCH = 2             # number of graphs / triples in the batch
    NODES_PER_G = 4
    N = BATCH * NODES_PER_G

    key = jax.random.PRNGKey(0)
    k_par, k_subj, k_obj, k_rel, k_neg = jax.random.split(key, 5)

    params = init_params(k_par, EMB_DIM)

    # two batched graphs (block-diagonal): simple DAG per graph
    per_graph_edges = [(0, 1), (0, 2), (1, 3), (2, 3)]
    edges = [(s + g * NODES_PER_G, d + g * NODES_PER_G)
             for g in range(BATCH) for (s, d) in per_graph_edges]
    subj_graph = prepare_batched_graph(edges, N, [NODES_PER_G] * BATCH)
    obj_graph = prepare_batched_graph(edges, N, [NODES_PER_G] * BATCH)

    subj_node_embs = jax.random.normal(k_subj, (N, EMB_DIM), jnp.float32)
    obj_node_embs = jax.random.normal(k_obj, (N, EMB_DIM), jnp.float32)
    rel_tok_embs = jax.random.normal(k_rel, (BATCH, EMB_DIM), jnp.float32)

    pos_scores, neg_scores = taxo_rel_olp_forward(
        params, subj_graph, subj_node_embs, rel_tok_embs,
        obj_graph, obj_node_embs, k_neg, norm=2)

    jax.block_until_ready((pos_scores, neg_scores))
    assert pos_scores.shape == (BATCH,) and neg_scores.shape == (BATCH,)
    assert bool(jnp.all(jnp.isfinite(pos_scores))) and bool(jnp.all(jnp.isfinite(neg_scores)))
    print("KERNEL_OK")
</pallas_src>

<mosaic_0001>
module attributes {stable_mosaic.version = 11 : i64} {
  func.func @_fused_taxorel_kernel(%arg0: memref<8x8xf32, #tpu.memory_space<vmem>>, %arg1: memref<8x8xf32, #tpu.memory_space<vmem>>, %arg2: memref<8x8xf32, #tpu.memory_space<vmem>>, %arg3: memref<8x8xf32, #tpu.memory_space<vmem>>, %arg4: memref<16x128xf32, #tpu.memory_space<vmem>>, %arg5: memref<8x8xf32, #tpu.memory_space<vmem>>, %arg6: memref<8x8xf32, #tpu.memory_space<vmem>>, %arg7: memref<8x128xf32, #tpu.memory_space<vmem>>, %arg8: memref<128x256xf32, #tpu.memory_space<vmem>>, %arg9: memref<1x128xf32, #tpu.memory_space<vmem>>, %arg10: memref<128x128xf32, #tpu.memory_space<vmem>>, %arg11: memref<128x128xf32, #tpu.memory_space<vmem>>, %arg12: memref<1x128xf32, #tpu.memory_space<vmem>>, %arg13: memref<128x128xf32, #tpu.memory_space<vmem>>, %arg14: memref<1x128xf32, #tpu.memory_space<vmem>>, %arg15: memref<128x128xf32, #tpu.memory_space<vmem>>, %arg16: memref<1x128xf32, #tpu.memory_space<vmem>>, %arg17: memref<8x8xf32, #tpu.memory_space<vmem>>, %arg18: memref<8x8xf32, #tpu.memory_space<vmem>>, %arg19: memref<8x128xf32, #tpu.memory_space<vmem>>, %arg20: memref<8x128xf32, #tpu.memory_space<vmem>>) attributes {dimension_semantics = [], scalar_prefetch = 0 : i64, scratch_operands = 0 : i64, tpu.core_type = #tpu.core_type<tc>} {
    %c0 = arith.constant 0 : index
    %c0_0 = arith.constant 0 : index
    %0 = vector.load %arg8[%c0, %c0_0] : memref<128x256xf32, #tpu.memory_space<vmem>>, vector<128x256xf32>
    %c0_1 = arith.constant 0 : index
    %c0_2 = arith.constant 0 : index
    %1 = vector.load %arg9[%c0_1, %c0_2] : memref<1x128xf32, #tpu.memory_space<vmem>>, vector<1x128xf32>
    %c0_3 = arith.constant 0 : index
    %c0_4 = arith.constant 0 : index
    %2 = vector.load %arg10[%c0_3, %c0_4] : memref<128x128xf32, #tpu.memory_space<vmem>>, vector<128x128xf32>
    %c0_5 = arith.constant 0 : index
    %c0_6 = arith.constant 0 : index
    %3 = vector.load %arg11[%c0_5, %c0_6] : memref<128x128xf32, #tpu.memory_space<vmem>>, vector<128x128xf32>
    %c0_7 = arith.constant 0 : index
    %c0_8 = arith.constant 0 : index
    %4 = vector.load %arg12[%c0_7, %c0_8] : memref<1x128xf32, #tpu.memory_space<vmem>>, vector<1x128xf32>
    %c0_9 = arith.constant 0 : index
    %c0_10 = arith.constant 0 : index
    %5 = vector.load %arg4[%c0_9, %c0_10] : memref<16x128xf32, #tpu.memory_space<vmem>>, vector<16x128xf32>
    %cst = arith.constant dense<0.000000e+00> : vector<16x256xf32>
    %6 = tpu.matmul %5, %0, %cst {dimension_numbers = #tpu.dot_dimension_numbers<[1], [0], [0], [1], [0, 0, 1, 1], [], []>} : vector<16x128xf32>, vector<128x256xf32>, vector<16x256xf32> -> vector<16x256xf32>
    %c0_11 = arith.constant 0 : index
    %c0_12 = arith.constant 0 : index
    %7 = vector.load %arg0[%c0_11, %c0_12] : memref<8x8xf32, #tpu.memory_space<vmem>>, vector<8x8xf32>
    %c0_13 = arith.constant 0 : index
    %c0_14 = arith.constant 0 : index
    %8 = vector.load %arg1[%c0_13, %c0_14] : memref<8x8xf32, #tpu.memory_space<vmem>>, vector<8x8xf32>
    %c0_15 = arith.constant 0 : index
    %c0_16 = arith.constant 0 : index
    %9 = vector.load %arg5[%c0_15, %c0_16] : memref<8x8xf32, #tpu.memory_space<vmem>>, vector<8x8xf32>
    %10 = vector.extract_strided_slice %6 {offsets = [0, 0], sizes = [8, 128], strides = [1, 1]} : vector<16x256xf32> to vector<8x128xf32>
    %11 = vector.extract_strided_slice %6 {offsets = [0, 128], sizes = [8, 128], strides = [1, 1]} : vector<16x256xf32> to vector<8x128xf32>
    %cst_17 = arith.constant dense<0.000000e+00> : vector<8x128xf32>
    %12 = tpu.matmul %7, %10, %cst_17 {dimension_numbers = #tpu.dot_dimension_numbers<[1], [0], [0], [1], [0, 0, 1, 1], [], []>} : vector<8x8xf32>, vector<8x128xf32>, vector<8x128xf32> -> vector<8x128xf32>
    %cst_18 = arith.constant dense<0.000000e+00> : vector<8x128xf32>
    %13 = tpu.matmul %8, %11, %cst_18 {dimension_numbers = #tpu.dot_dimension_numbers<[1], [0], [0], [1], [0, 0, 1, 1], [], []>} : vector<8x8xf32>, vector<8x128xf32>, vector<8x128xf32> -> vector<8x128xf32>
    %14 = arith.addf %12, %13 : vector<8x128xf32>
    %15 = vector.broadcast %1 : vector<1x128xf32> to vector<8x128xf32>
    %16 = arith.addf %14, %15 : vector<8x128xf32>
    %cst_19 = arith.constant 0.000000e+00 : f32
    %17 = vector.broadcast %cst_19 : f32 to vector<8x128xf32>
    %18 = arith.maximumf %16, %17 : vector<8x128xf32>
    %cst_20 = arith.constant dense<0.000000e+00> : vector<8x128xf32>
    %19 = tpu.matmul %7, %18, %cst_20 {dimension_numbers = #tpu.dot_dimension_numbers<[1], [0], [0], [1], [0, 0, 1, 1], [], []>} : vector<8x8xf32>, vector<8x128xf32>, vector<8x128xf32> -> vector<8x128xf32>
    %cst_21 = arith.constant dense<0.000000e+00> : vector<8x128xf32>
    %20 = tpu.matmul %8, %18, %cst_21 {dimension_numbers = #tpu.dot_dimension_numbers<[1], [0], [0], [1], [0, 0, 1, 1], [], []>} : vector<8x8xf32>, vector<8x128xf32>, vector<8x128xf32> -> vector<8x128xf32>
    %cst_22 = arith.constant dense<0.000000e+00> : vector<8x128xf32>
    %21 = tpu.matmul %19, %2, %cst_22 {dimension_numbers = #tpu.dot_dimension_numbers<[1], [0], [0], [1], [0, 0, 1, 1], [], []>} : vector<8x128xf32>, vector<128x128xf32>, vector<8x128xf32> -> vector<8x128xf32>
    %cst_23 = arith.constant dense<0.000000e+00> : vector<8x128xf32>
    %22 = tpu.matmul %20, %3, %cst_23 {dimension_numbers = #tpu.dot_dimension_numbers<[1], [0], [0], [1], [0, 0, 1, 1], [], []>} : vector<8x128xf32>, vector<128x128xf32>, vector<8x128xf32> -> vector<8x128xf32>
    %23 = arith.addf %21, %22 : vector<8x128xf32>
    %24 = vector.broadcast %4 : vector<1x128xf32> to vector<8x128xf32>
    %25 = arith.addf %23, %24 : vector<8x128xf32>
    %cst_24 = arith.constant dense<0.000000e+00> : vector<8x128xf32>
    %26 = tpu.matmul %9, %25, %cst_24 {dimension_numbers = #tpu.dot_dimension_numbers<[1], [0], [0], [1], [0, 0, 1, 1], [], []>} : vector<8x8xf32>, vector<8x128xf32>, vector<8x128xf32> -> vector<8x128xf32>
    %c0_25 = arith.constant 0 : index
    %c0_26 = arith.constant 0 : index
    %27 = vector.load %arg2[%c0_25, %c0_26] : memref<8x8xf32, #tpu.memory_space<vmem>>, vector<8x8xf32>
    %c0_27 = arith.constant 0 : index
    %c0_28 = arith.constant 0 : index
    %28 = vector.load %arg3[%c0_27, %c0_28] : memref<8x8xf32, #tpu.memory_space<vmem>>, vector<8x8xf32>
    %c0_29 = arith.constant 0 : index
    %c0_30 = arith.constant 0 : index
    %29 = vector.load %arg6[%c0_29, %c0_30] : memref<8x8xf32, #tpu.memory_space<vmem>>, vector<8x8xf32>
    %30 = vector.extract_strided_slice %6 {offsets = [8, 0], sizes = [8, 128], strides = [1, 1]} : vector<16x256xf32> to vector<8x128xf32>
    %31 = vector.extract_strided_slice %6 {offsets = [8, 128], sizes = [8, 128], strides = [1, 1]} : vector<16x256xf32> to vector<8x128xf32>
    %cst_31 = arith.constant dense<0.000000e+00> : vector<8x128xf32>
    %32 = tpu.matmul %27, %30, %cst_31 {dimension_numbers = #tpu.dot_dimension_numbers<[1], [0], [0], [1], [0, 0, 1, 1], [], []>} : vector<8x8xf32>, vector<8x128xf32>, vector<8x128xf32> -> vector<8x128xf32>
    %cst_32 = arith.constant dense<0.000000e+00> : vector<8x128xf32>
    %33 = tpu.matmul %28, %31, %cst_32 {dimension_numbers = #tpu.dot_dimension_numbers<[1], [0], [0], [1], [0, 0, 1, 1], [], []>} : vector<8x8xf32>, vector<8x128xf32>, vector<8x128xf32> -> vector<8x128xf32>
    %34 = arith.addf %32, %33 : vector<8x128xf32>
    %35 = vector.broadcast %1 : vector<1x128xf32> to vector<8x128xf32>
    %36 = arith.addf %34, %35 : vector<8x128xf32>
    %cst_33 = arith.constant 0.000000e+00 : f32
    %37 = vector.broadcast %cst_33 : f32 to vector<8x128xf32>
    %38 = arith.maximumf %36, %37 : vector<8x128xf32>
    %cst_34 = arith.constant dense<0.000000e+00> : vector<8x128xf32>
    %39 = tpu.matmul %27, %38, %cst_34 {dimension_numbers = #tpu.dot_dimension_numbers<[1], [0], [0], [1], [0, 0, 1, 1], [], []>} : vector<8x8xf32>, vector<8x128xf32>, vector<8x128xf32> -> vector<8x128xf32>
    %cst_35 = arith.constant dense<0.000000e+00> : vector<8x128xf32>
    %40 = tpu.matmul %28, %38, %cst_35 {dimension_numbers = #tpu.dot_dimension_numbers<[1], [0], [0], [1], [0, 0, 1, 1], [], []>} : vector<8x8xf32>, vector<8x128xf32>, vector<8x128xf32> -> vector<8x128xf32>
    %cst_36 = arith.constant dense<0.000000e+00> : vector<8x128xf32>
    %41 = tpu.matmul %39, %2, %cst_36 {dimension_numbers = #tpu.dot_dimension_numbers<[1], [0], [0], [1], [0, 0, 1, 1], [], []>} : vector<8x128xf32>, vector<128x128xf32>, vector<8x128xf32> -> vector<8x128xf32>
    %cst_37 = arith.constant dense<0.000000e+00> : vector<8x128xf32>
    %42 = tpu.matmul %40, %3, %cst_37 {dimension_numbers = #tpu.dot_dimension_numbers<[1], [0], [0], [1], [0, 0, 1, 1], [], []>} : vector<8x128xf32>, vector<128x128xf32>, vector<8x128xf32> -> vector<8x128xf32>
    %43 = arith.addf %41, %42 : vector<8x128xf32>
    %44 = vector.broadcast %4 : vector<1x128xf32> to vector<8x128xf32>
    %45 = arith.addf %43, %44 : vector<8x128xf32>
    %cst_38 = arith.constant dense<0.000000e+00> : vector<8x128xf32>
    %46 = tpu.matmul %29, %45, %cst_38 {dimension_numbers = #tpu.dot_dimension_numbers<[1], [0], [0], [1], [0, 0, 1, 1], [], []>} : vector<8x8xf32>, vector<8x128xf32>, vector<8x128xf32> -> vector<8x128xf32>
    %c0_39 = arith.constant 0 : index
    %c0_40 = arith.constant 0 : index
    %47 = vector.load %arg7[%c0_39, %c0_40] : memref<8x128xf32, #tpu.memory_space<vmem>>, vector<8x128xf32>
    %c0_41 = arith.constant 0 : index
    %c0_42 = arith.constant 0 : index
    %48 = vector.load %arg13[%c0_41, %c0_42] : memref<128x128xf32, #tpu.memory_space<vmem>>, vector<128x128xf32>
    %cst_43 = arith.constant dense<0.000000e+00> : vector<8x128xf32>
    %49 = tpu.matmul %47, %48, %cst_43 {dimension_numbers = #tpu.dot_dimension_numbers<[1], [0], [0], [1], [0, 0, 1, 1], [], []>} : vector<8x128xf32>, vector<128x128xf32>, vector<8x128xf32> -> vector<8x128xf32>
    %c0_44 = arith.constant 0 : index
    %c0_45 = arith.constant 0 : index
    %50 = vector.load %arg14[%c0_44, %c0_45] : memref<1x128xf32, #tpu.memory_space<vmem>>, vector<1x128xf32>
    %51 = vector.broadcast %50 : vector<1x128xf32> to vector<8x128xf32>
    %52 = arith.addf %49, %51 : vector<8x128xf32>
    %cst_46 = arith.constant 0.000000e+00 : f32
    %53 = vector.broadcast %cst_46 : f32 to vector<8x128xf32>
    %54 = arith.maximumf %52, %53 : vector<8x128xf32>
    %c0_47 = arith.constant 0 : index
    %c0_48 = arith.constant 0 : index
    %55 = vector.load %arg15[%c0_47, %c0_48] : memref<128x128xf32, #tpu.memory_space<vmem>>, vector<128x128xf32>
    %cst_49 = arith.constant dense<0.000000e+00> : vector<8x128xf32>
    %56 = tpu.matmul %54, %55, %cst_49 {dimension_numbers = #tpu.dot_dimension_numbers<[1], [0], [0], [1], [0, 0, 1, 1], [], []>} : vector<8x128xf32>, vector<128x128xf32>, vector<8x128xf32> -> vector<8x128xf32>
    %c0_50 = arith.constant 0 : index
    %c0_51 = arith.constant 0 : index
    %57 = vector.load %arg16[%c0_50, %c0_51] : memref<1x128xf32, #tpu.memory_space<vmem>>, vector<1x128xf32>
    %58 = vector.broadcast %57 : vector<1x128xf32> to vector<8x128xf32>
    %59 = arith.addf %56, %58 : vector<8x128xf32>
    %c0_52 = arith.constant 0 : index
    %c0_53 = arith.constant 0 : index
    %60 = vector.load %arg17[%c0_52, %c0_53] : memref<8x8xf32, #tpu.memory_space<vmem>>, vector<8x8xf32>
    %cst_54 = arith.constant dense<0.000000e+00> : vector<8x128xf32>
    %61 = tpu.matmul %60, %26, %cst_54 {dimension_numbers = #tpu.dot_dimension_numbers<[1], [0], [0], [1], [0, 0, 1, 1], [], []>} : vector<8x8xf32>, vector<8x128xf32>, vector<8x128xf32> -> vector<8x128xf32>
    %c0_55 = arith.constant 0 : index
    %c0_56 = arith.constant 0 : index
    %62 = vector.load %arg18[%c0_55, %c0_56] : memref<8x8xf32, #tpu.memory_space<vmem>>, vector<8x8xf32>
    %cst_57 = arith.constant dense<0.000000e+00> : vector<8x128xf32>
    %63 = tpu.matmul %62, %46, %cst_57 {dimension_numbers = #tpu.dot_dimension_numbers<[1], [0], [0], [1], [0, 0, 1, 1], [], []>} : vector<8x8xf32>, vector<8x128xf32>, vector<8x128xf32> -> vector<8x128xf32>
    %64 = arith.addf %26, %59 : vector<8x128xf32>
    %65 = arith.subf %64, %46 : vector<8x128xf32>
    %66 = arith.addf %61, %59 : vector<8x128xf32>
    %67 = arith.subf %66, %63 : vector<8x128xf32>
    %68 = arith.mulf %65, %65 : vector<8x128xf32>
    %cst_58 = arith.constant dense<0.000000e+00> : vector<8xf32>
    %69 = vector.multi_reduction <add>, %68, %cst_58 [1] : vector<8x128xf32> to vector<8xf32>
    %70 = vector.shape_cast %69 : vector<8xf32> to vector<8x1xf32>
    %71 = math.sqrt %70 : vector<8x1xf32>
    %72 = arith.mulf %67, %67 : vector<8x128xf32>
    %cst_59 = arith.constant dense<0.000000e+00> : vector<8xf32>
    %73 = vector.multi_reduction <add>, %72, %cst_59 [1] : vector<8x128xf32> to vector<8xf32>
    %74 = vector.shape_cast %73 : vector<8xf32> to vector<8x1xf32>
    %75 = math.sqrt %74 : vector<8x1xf32>
    %76 = vector.shape_cast %71 : vector<8x1xf32> to vector<8x1xf32>
    %77 = vector.broadcast %76 : vector<8x1xf32> to vector<8x128xf32>
    %c0_60 = arith.constant 0 : index
    %c0_61 = arith.constant 0 : index
    %78 = vector.load %arg19[%c0_60, %c0_61] : memref<8x128xf32, #tpu.memory_space<vmem>>, vector<8x128xf32>
    tpu.vector_store %arg19[%c0_60, %c0_61], %77 {strides = array<i32>} : memref<8x128xf32, #tpu.memory_space<vmem>>, vector<8x128xf32>,
    %79 = vector.shape_cast %75 : vector<8x1xf32> to vector<8x1xf32>
    %80 = vector.broadcast %79 : vector<8x1xf32> to vector<8x128xf32>
    %c0_62 = arith.constant 0 : index
    %c0_63 = arith.constant 0 : index
    %81 = vector.load %arg20[%c0_62, %c0_63] : memref<8x128xf32, #tpu.memory_space<vmem>>, vector<8x128xf32>
    tpu.vector_store %arg20[%c0_62, %c0_63], %80 {strides = array<i32>} : memref<8x128xf32, #tpu.memory_space<vmem>>, vector<8x128xf32>,
    return
  }
}

</mosaic_0001>

<bundles_post_ra>
// kernel: tpu_custom_call.1
= control target key start
LH: loop header
LB: loop body
LE: loop exit
PB: predicated region body
PF: predicated region fallthrough
CT: control target
= control target key end

     0   :  { %s3026_s0 = inlined_call_operand.hbm [shape: f32[8,8], index: 0, kind: input, shape index: {}]   ;;  %s3027_s1 = inlined_call_operand.hbm [shape: f32[8,8], index: 1, kind: input, shape index: {}]   ;;  %s3028_s2 = inlined_call_operand.hbm [shape: f32[8,8], index: 2, kind: input, shape index: {}]   ;;  %s3029_s3 = inlined_call_operand.hbm [shape: f32[8,8], index: 3, kind: input, shape index: {}]   ;;  %s3030_s4 = inlined_call_operand.hbm [shape: f32[16,128], index: 4, kind: input, shape index: {}]   ;;  %s3031_s5 = inlined_call_operand.vmem [shape: f32[8,8], index: 5, kind: input, shape index: {}]   ;;  %s3032_s6 = inlined_call_operand.hbm [shape: f32[8,8], index: 6, kind: input, shape index: {}]   ;;  %s3033_s7 = inlined_call_operand.hbm [shape: f32[8,128], index: 7, kind: input, shape index: {}]   ;;  %s3034_s8 = inlined_call_operand.hbm [shape: f32[128,256], index: 8, kind: input, shape index: {}]   ;;  %s3035_s9 = inlined_call_operand.hbm [shape: f32[1,128], index: 9, kind: input, shape index: {}]   ;;  %s3036_s10 = inlined_call_operand.hbm [shape: f32[128,128], index: 10, kind: input, shape index: {}]   ;;  %s3037_s11 = inlined_call_operand.hbm [shape: f32[128,128], index: 11, kind: input, shape index: {}]   ;;  %s3038_s12 = inlined_call_operand.vmem [shape: f32[1,128], index: 12, kind: input, shape index: {}]   ;;  %s3039_s13 = inlined_call_operand.hbm [shape: f32[128,128], index: 13, kind: input, shape index: {}]   ;;  %s3040_s14 = inlined_call_operand.hbm [shape: f32[1,128], index: 14, kind: input, shape index: {}]   ;;  %s3041_s15 = inlined_call_operand.hbm [shape: f32[128,128], index: 15, kind: input, shape index: {}]   ;;  %s3042_s16 = inlined_call_operand.vmem [shape: f32[1,128], index: 16, kind: input, shape index: {}]   ;;  %s3043_s17 = inlined_call_operand.vmem [shape: f32[8,8], index: 17, kind: input, shape index: {}]   ;;  %s3044_s18 = inlined_call_operand.vmem [shape: f32[8,8], index: 18, kind: input, shape index: {}]   ;;  %s3045_s19 = inlined_call_operand.hbm [shape: f32[8,128], index: 19, kind: output, shape index: {0}]   ;;  %s3046_s20 = inlined_call_operand.hbm [shape: f32[8,128], index: 20, kind: output, shape index: {1}]  }
   0x1   :  { %3047 = sst [smem:[#allocation38_spill]] %s3026_s0 }
   0x2   :  { %3048 = sst [smem:[#allocation39_spill]] %s3027_s1 }
   0x3   :  { %3049 = sst [smem:[#allocation40_spill]] %s3028_s2 }
   0x4   :  { %3050 = sst [smem:[#allocation41_spill]] %s3029_s3 }
   0x5   :  { %3051 = sst [smem:[#allocation42_spill]] %s3030_s4 }
   0x6   :  { %26 = vsyncpa [#allocation3], 0 }
   0x7   :  { %27 = vsyncpa [#allocation6], 0 }
   0x8   :  { %28 = vsyncpa [#allocation9], 0 }
   0x9   :  { %29 = vsyncpa [#allocation12], 0 }
   0xa   :  { %30 = vsyncpa [#allocation15], 0 }
   0xb   :  { %31 = vsyncpa [#allocation18], 0 }
   0xc   :  { %32 = vsyncpa [#allocation21], 0 }
   0xd   :  { %33 = vsyncpa [#allocation24], 0 }
   0xe   :  { %34 = vsyncpa [#allocation4], 0 }
   0xf   :  { %35 = vsyncpa [#allocation27], 0  ;;  %s2583_s1 = smov [#allocation5]   ;;  %s2584_s23 = smov [#allocation8]  }
  0x10   :  { %s52_s22 = sshll.u32 %s2583_s1, 4  ;;  %s72_s24 = sshll.u32 %s2584_s23, 4  ;;  %s53_s22 = int_to_ptr.vmem [resolvable:$true] %s52_s22  ;;  %s73_s24 = int_to_ptr.vmem [resolvable:$true] %s72_s24 }
  0x11   :  { %s2251_s2 = scalar_lea.vmem %s53_s22, 128  ;;  %p2256_p1 = scmp.lt.s32.totalorder %s53_s22, %s53_s22 }
  0x12   :  { %p2252_p0 = scmp.ne.s32.totalorder %s53_s22, %s2251_s2  ;;  %p2257_p2 = scmp.lt.s32.totalorder %s2251_s2, %s2251_s2 }
  0x14   :  { %p2258_p3 = por %p2257_p2, %p2256_p1 }
  0x16   :  { %p2259_p4 = pnand %p2258_p3, %p2252_p0 }
  0x18   :  { %2262 = shalt.err (!%p2259_p4)
}
  0x19   :  { %s3052_s26 = sld [smem:[#allocation39_spill]]  ;;  %s2271_s27 = scalar_lea.vmem %s73_s24, 128 }
  0x1a   :  { %p2272_p5 = scmp.ne.s32.totalorder %s73_s24, %s2271_s27  ;;  %p2276_p6 = scmp.lt.s32.totalorder %s73_s24, %s73_s24 }
  0x1b   :  { %p2277_p7 = scmp.lt.s32.totalorder %s2271_s27, %s2271_s27 }
  0x1d   :  { %p2278_p8 = por %p2277_p7, %p2276_p6 }
  0x1f   :  { %55 = dma.hbm_to_vmem [thread:$0]  %s3052_s26, 128, %s53_s22, [#allocation6]  }
  0x20   :  { %p2279_p9 = pnand %p2278_p8, %p2272_p5 }
  0x22   :  { %2282 = shalt.err (!%p2279_p9)
}
  0x23   :  { %s3053_s29 = sld [smem:[#allocation41_spill]]  ;;  %s2585_s30 = smov [#allocation11]  }
  0x24   :  { %s96_s0 = sshll.u32 %s2585_s30, 4  ;;  %s2586_s21 = smov [#allocation14]   ;;  %s97_s0 = int_to_ptr.vmem [resolvable:$true] %s96_s0 }
  0x25   :  { %s115_s1 = sshll.u32 %s2586_s21, 4  ;;  %s2291_s23 = scalar_lea.vmem %s97_s0, 128  ;;  %s116_s1 = int_to_ptr.vmem [resolvable:$true] %s115_s1 }
  0x26   :  { %p2292_p10 = scmp.ne.s32.totalorder %s97_s0, %s2291_s23  ;;  %p2296_p11 = scmp.lt.s32.totalorder %s97_s0, %s97_s0 }
  0x27   :  { %p2297_p12 = scmp.lt.s32.totalorder %s2291_s23, %s2291_s23 }
  0x29   :  { %75 = dma.hbm_to_vmem [thread:$0]  %s3053_s29, 128, %s73_s24, [#allocation9]  }
  0x2a   :  { %p2298_p13 = por %p2297_p12, %p2296_p11 }
  0x2c   :  { %p2299_p0 = pnand %p2298_p13, %p2292_p10 }
  0x2e   :  { %2302 = shalt.err (!%p2299_p0)
}
  0x2f   :  { %99 = dma.hbm_to_vmem [thread:$0]  %s3032_s6, 128, %s97_s0, [#allocation12]  }
  0x30   :  { %s2311_s25 = scalar_lea.vmem %s116_s1, 4096  ;;  %p2316_p2 = scmp.lt.s32.totalorder %s116_s1, %s116_s1 }
  0x31   :  { %p2312_p1 = scmp.ne.s32.totalorder %s116_s1, %s2311_s25  ;;  %p2317_p3 = scmp.lt.s32.totalorder %s2311_s25, %s2311_s25 }
  0x33   :  { %p2318_p4 = por %p2317_p3, %p2316_p2 }
  0x35   :  { %p2319_p5 = pnand %p2318_p4, %p2312_p1 }
  0x37   :  { %2322 = shalt.err (!%p2319_p5)
}
  0x38   :  { %s2587_s24 = smov 256   ;;  %s2588_s3 = smov 16  }
  0x39   :  { %121 = dma.hbm_to_vmem [thread:$0]  %s3034_s8, 4096, %s116_s1, [#allocation15], %s2587_s24, %s2587_s24, %s2588_s3  }
  0x3a   :  { %s2589_s28 = smov [#allocation17]   ;;  %s2590_s29 = smov [#allocation20]  }
  0x3b   :  { %s137_s4 = sshll.u32 %s2589_s28, 4  ;;  %s163_s30 = sshll.u32 %s2590_s29, 4  ;;  %s138_s4 = int_to_ptr.vmem [resolvable:$true] %s137_s4  ;;  %s164_s30 = int_to_ptr.vmem [resolvable:$true] %s163_s30 }
  0x3c   :  { %s2331_s6 = scalar_lea.vmem %s138_s4, 2048  ;;  %p2336_p7 = scmp.lt.s32.totalorder %s138_s4, %s138_s4 }
  0x3d   :  { %p2332_p6 = scmp.ne.s32.totalorder %s138_s4, %s2331_s6  ;;  %p2337_p8 = scmp.lt.s32.totalorder %s2331_s6, %s2331_s6 }
  0x3f   :  { %p2338_p9 = por %p2337_p8, %p2336_p7 }
  0x41   :  { %p2339_p10 = pnand %p2338_p9, %p2332_p6 }
  0x43   :  { %2342 = shalt.err (!%p2339_p10)
}
  0x44   :  { %s2591_s0 = smov 128   ;;  %s2592_s21 = smov 8  }
  0x45   :  { %143 = dma.hbm_to_vmem [thread:$0]  %s3036_s10, 2048, %s138_s4, [#allocation18], %s2591_s0, %s2591_s0, %s2592_s21  }
  0x46   :  { %s2351_s1 = scalar_lea.vmem %s164_s30, 2048  ;;  %p2356_p12 = scmp.lt.s32.totalorder %s164_s30, %s164_s30 }
  0x47   :  { %p2352_p11 = scmp.ne.s32.totalorder %s164_s30, %s2351_s1  ;;  %p2357_p13 = scmp.lt.s32.totalorder %s2351_s1, %s2351_s1 }
  0x49   :  { %p2358_p0 = por %p2357_p13, %p2356_p12 }
  0x4b   :  { %p2359_p1 = pnand %p2358_p0, %p2352_p11 }
  0x4d   :  { %2362 = shalt.err (!%p2359_p1)
}
  0x4e   :  { %169 = dma.hbm_to_vmem [thread:$0]  %s3039_s13, 2048, %s164_s30, [#allocation21], %s2591_s0, %s2591_s0, %s2592_s21  }
  0x4f   :  { %s2593_s25 = smov [#allocation2]   ;;  %s2594_s3 = smov [#allocation7]  }
  0x50   :  { %s42_s24 = sshll.u32 %s2593_s25, 4  ;;  %s62_s26 = sshll.u32 %s2594_s3, 4  ;;  %s43_s24 = int_to_ptr.vmem [resolvable:$true] %s42_s24  ;;  %s63_s26 = int_to_ptr.vmem [resolvable:$true] %s62_s26 }
  0x51   :  { %s2371_s10 = scalar_lea.vmem %s43_s24, 128  ;;  %p2376_p3 = scmp.lt.s32.totalorder %s43_s24, %s43_s24 }
  0x52   :  { %p2372_p2 = scmp.ne.s32.totalorder %s43_s24, %s2371_s10  ;;  %p2377_p4 = scmp.lt.s32.totalorder %s2371_s10, %s2371_s10 }
  0x54   :  { %p2378_p5 = por %p2377_p4, %p2376_p3 }
  0x56   :  { %p2379_p6 = pnand %p2378_p5, %p2372_p2 }
  0x58   :  { %2382 = shalt.err (!%p2379_p6)
}
  0x59   :  { %s3054_s4 = sld [smem:[#allocation38_spill]]  ;;  %s2391_s29 = scalar_lea.vmem %s63_s26, 128 }
  0x5a   :  { %p2392_p7 = scmp.ne.s32.totalorder %s63_s26, %s2391_s29  ;;  %p2396_p8 = scmp.lt.s32.totalorder %s63_s26, %s63_s26 }
  0x5b   :  { %p2397_p9 = scmp.lt.s32.totalorder %s2391_s29, %s2391_s29 }
  0x5d   :  { %p2398_p10 = por %p2397_p9, %p2396_p8 }
  0x5f   :  { %45 = dma.hbm_to_vmem [thread:$0]  %s3054_s4, 128, %s43_s24, [#allocation3]  }
  0x60   :  { %p2399_p11 = pnand %p2398_p10, %p2392_p7 }
  0x62   :  { %2402 = shalt.err (!%p2399_p11)
}
  0x63   :  { %s3055_s6 = sld [smem:[#allocation40_spill]]  ;;  %s2595_s23 = smov [#allocation10]  }
  0x64   :  { %s81_s8 = sshll.u32 %s2595_s23, 4  ;;  %s2596_s1 = smov [#allocation13]   ;;  %s82_s8 = int_to_ptr.vmem [resolvable:$true] %s81_s8 }
  0x65   :  { %s106_s22 = sshll.u32 %s2596_s1, 4  ;;  %s2411_s2 = scalar_lea.vmem %s82_s8, 256  ;;  %s107_s22 = int_to_ptr.vmem [resolvable:$true] %s106_s22 }
  0x66   :  { %p2412_p12 = scmp.ne.s32.totalorder %s82_s8, %s2411_s2  ;;  %p2416_p13 = scmp.lt.s32.totalorder %s82_s8, %s82_s8 }
  0x67   :  { %p2417_p0 = scmp.lt.s32.totalorder %s2411_s2, %s2411_s2 }
  0x69   :  { %65 = dma.hbm_to_vmem [thread:$0]  %s3055_s6, 128, %s63_s26, [#allocation6]  }
  0x6a   :  { %p2418_p1 = por %p2417_p0, %p2416_p13 }
  0x6c   :  { %p2419_p2 = pnand %p2418_p1, %p2412_p12 }
  0x6e   :  { %2422 = shalt.err (!%p2419_p2)
}
  0x6f   :  { %s3056_s3 = sld [smem:[#allocation42_spill]]  ;;  %s2431_s26 = scalar_lea.vmem %s107_s22, 128 }
  0x70   :  { %p2432_p3 = scmp.ne.s32.totalorder %s107_s22, %s2431_s26  ;;  %p2436_p4 = scmp.lt.s32.totalorder %s107_s22, %s107_s22 }
  0x71   :  { %p2437_p5 = scmp.lt.s32.totalorder %s2431_s26, %s2431_s26 }
  0x73   :  { %p2438_p6 = por %p2437_p5, %p2436_p4 }
  0x75   :  { %87 = dma.hbm_to_vmem [thread:$0]  %s3056_s3, 256, %s82_s8, [#allocation9], %s2591_s0, %s2591_s0, %s2592_s21  }
  0x76   :  { %p2439_p7 = pnand %p2438_p6, %p2432_p3 }
  0x78   :  { %2442 = shalt.err (!%p2439_p7)
}
  0x79   :  { %109 = dma.hbm_to_vmem [thread:$0]  %s3033_s7, 128, %s107_s22, [#allocation12]  }
  0x7a   :  { %s2597_s28 = smov [#allocation16]   ;;  %s2598_s29 = smov [#allocation19]  }
  0x7b   :  { %s128_s4 = sshll.u32 %s2597_s28, 4  ;;  %s149_s13 = sshll.u32 %s2598_s29, 4  ;;  %s129_s4 = int_to_ptr.vmem [resolvable:$true] %s128_s4  ;;  %s150_s13 = int_to_ptr.vmem [resolvable:$true] %s149_s13 }
  0x7c   :  { %s2451_s30 = scalar_lea.vmem %s129_s4, 16  ;;  %s2455_s6 = scalar_lea.vmem %s129_s4, 32 }
  0x7d   :  { %p2452_p8 = scmp.ne.s32.totalorder %s129_s4, %s2451_s30  ;;  %p2456_p9 = scmp.lt.s32.totalorder %s129_s4, %s129_s4 }
  0x7e   :  { %p2457_p10 = scmp.lt.s32.totalorder %s2455_s6, %s2451_s30 }
  0x80   :  { %p2458_p11 = por %p2457_p10, %p2456_p9 }
  0x82   :  { %p2459_p12 = pnand %p2458_p11, %p2452_p8 }
  0x84   :  { %2462 = shalt.err (!%p2459_p12)
}
  0x85   :  { %131 = dma.hbm_to_vmem [thread:$0]  %s3035_s9, 16, %s129_s4, [#allocation15]  }
  0x86   :  { %s2471_s1 = scalar_lea.vmem %s150_s13, 2048  ;;  %p2476_p0 = scmp.lt.s32.totalorder %s150_s13, %s150_s13 }
  0x87   :  { %p2472_p13 = scmp.ne.s32.totalorder %s150_s13, %s2471_s1  ;;  %p2477_p1 = scmp.lt.s32.totalorder %s2471_s1, %s2471_s1 }
  0x89   :  { %p2478_p2 = por %p2477_p1, %p2476_p0 }
  0x8b   :  { %p2479_p3 = pnand %p2478_p2, %p2472_p13 }
  0x8d   :  { %2482 = shalt.err (!%p2479_p3)
}
  0x8e   :  { %155 = dma.hbm_to_vmem [thread:$0]  %s3037_s11, 2048, %s150_s13, [#allocation18], %s2591_s0, %s2591_s0, %s2592_s21  }
  0x8f   :  { %s2599_s2 = smov [#allocation22]   ;;  %s2600_s24 = smov [#allocation23]  }
  0x90   :  { %s176_s25 = sshll.u32 %s2599_s2, 4  ;;  %s185_s3 = sshll.u32 %s2600_s24, 4  ;;  %s177_s25 = int_to_ptr.vmem [resolvable:$true] %s176_s25  ;;  %s186_s3 = int_to_ptr.vmem [resolvable:$true] %s185_s3 }
  0x91   :  { %s2491_s9 = scalar_lea.vmem %s177_s25, 16  ;;  %s2495_s26 = scalar_lea.vmem %s177_s25, 32 }
  0x92   :  { %p2492_p4 = scmp.ne.s32.totalorder %s177_s25, %s2491_s9  ;;  %p2496_p5 = scmp.lt.s32.totalorder %s177_s25, %s177_s25 }
  0x93   :  { %p2497_p6 = scmp.lt.s32.totalorder %s2495_s26, %s2491_s9 }
  0x95   :  { %p2498_p7 = por %p2497_p6, %p2496_p5 }
  0x97   :  { %p2499_p8 = pnand %p2498_p7, %p2492_p4 }
  0x99   :  { %2502 = shalt.err (!%p2499_p8)
}
  0x9a   :  { %179 = dma.hbm_to_vmem [thread:$0]  %s3040_s14, 16, %s177_s25, [#allocation21]  }
  0x9b   :  { %s2511_s28 = scalar_lea.vmem %s186_s3, 2048  ;;  %p2516_p10 = scmp.lt.s32.totalorder %s186_s3, %s186_s3 }
  0x9c   :  { %p2512_p9 = scmp.ne.s32.totalorder %s186_s3, %s2511_s28  ;;  %p2517_p11 = scmp.lt.s32.totalorder %s2511_s28, %s2511_s28 }
  0x9e   :  { %p2518_p12 = por %p2517_p11, %p2516_p10 }
  0xa0   :  { %p2519_p13 = pnand %p2518_p12, %p2512_p9 }
  0xa2   :  { %2522 = shalt.err (!%p2519_p13)
}
  0xa3   :  { %191 = dma.hbm_to_vmem [thread:$0]  %s3041_s15, 2048, %s186_s3, [#allocation24], %s2591_s0, %s2591_s0, %s2592_s21  }
  0xa4   :  { %2563 = dma.done.wait [#allocation3], 128  }
  0xa5   :  { %2564 = vsyncadd [#allocation3], 4294967168 }
  0xa6   :  { %2565 = dma.done.wait [#allocation6], 256  }
  0xa7   :  { %2566 = vsyncadd [#allocation6], 4294967040 }
  0xa8   :  { %2567 = dma.done.wait [#allocation9], 384  }
  0xa9   :  { %2568 = vsyncadd [#allocation9], 4294966912 }
  0xaa   :  { %2569 = dma.done.wait [#allocation12], 256  }
  0xab   :  { %2570 = vsyncadd [#allocation12], 4294967040 }
  0xac   :  { %2571 = dma.done.wait [#allocation15], 4112  }
  0xad   :  { %2572 = vsyncadd [#allocation15], 4294963184 }
  0xae   :  { %2573 = dma.done.wait [#allocation18], 4096  }
  0xaf   :  { %2574 = vsyncadd [#allocation18], 4294963200 }
  0xb0   :  { %2575 = dma.done.wait [#allocation21], 2064  }
  0xb1   :  { %2576 = vsyncadd [#allocation21], 4294965232 }
  0xb2   :  { %2577 = dma.done.wait [#allocation24], 2048  }
  0xb3   :  { %2578 = vsyncadd [#allocation24], 4294965248  ;;  %v2601_v0 = vmov 0.0   ;;  %v271_v1 = vld [vmem:[#allocation14 + $0xf8] sm:$0xff]  ;;  %v270_v2 = vld [vmem:[#allocation14 + $0xf0] sm:$0xff]  ;;  %vm2602_vm0 = vmmov 0  }
  0xb4   :  { %372 = vmatprep.mubr.f32.mxu0 %v2601_v0  ;;  %1947 = vmatprep.subr.mxu1 %v2601_v0  ;;  %v269_v3 = vld [vmem:[#allocation14 + $0xe8] sm:$0xff]  ;;  %v268_v4 = vld [vmem:[#allocation14 + $0xe0] sm:$0xff]  ;;  %v267_v5 = vld [vmem:[#allocation14 + $0xd8] sm:$0xff]  ;;  %vm388_vm1 = vcmask 64512  }
  0xb5   :  { %308 = vmatprep.subr.mxu0 %v271_v1  ;;  %v266_v6 = vld [vmem:[#allocation14 + $0xd0] sm:$0xff]  ;;  %v265_v7 = vld [vmem:[#allocation14 + $0xc8] sm:$0xff]  ;;  %v264_v8 = vld [vmem:[#allocation14 + $0xc0] sm:$0xff]  ;;  %1949 = vmatprep.mubr.msk.f32.mxu1 %vm2602_vm0, %v2601_v0 }
  0xb6   :  { %309 = vmatpush1.msra.mxu0 %v270_v2  ;;  %v263_v9 = vld [vmem:[#allocation14 + $0xb8] sm:$0xff]  ;;  %v262_v10 = vld [vmem:[#allocation14 + $0xb0] sm:$0xff]  ;;  %v261_v11 = vld [vmem:[#allocation14 + $0xa8] sm:$0xff] }
  0xb7   :  { %310 = vmatprep.subr.mxu0 %v269_v3  ;;  %v260_v12 = vld [vmem:[#allocation14 + $0xa0] sm:$0xff]  ;;  %v259_v13 = vld [vmem:[#allocation14 + $0x98] sm:$0xff]  ;;  %v258_v14 = vld [vmem:[#allocation14 + $0x90] sm:$0xff] }
  0xb8   :  { %311 = vmatpush1.msra.mxu0 %v268_v4  ;;  %v257_v15 = vld [vmem:[#allocation14 + $0x88] sm:$0xff]  ;;  %v256_v16 = vld [vmem:[#allocation14 + $0x80] sm:$0xff]  ;;  %v255_v17 = vld [vmem:[#allocation14 + $0x78] sm:$0xff] }
  0xb9   :  { %312 = vmatprep.subr.mxu0 %v267_v5  ;;  %v254_v18 = vld [vmem:[#allocation14 + $0x70] sm:$0xff]  ;;  %v253_v19 = vld [vmem:[#allocation14 + $0x68] sm:$0xff]  ;;  %v252_v20 = vld [vmem:[#allocation14 + $0x60] sm:$0xff] }
  0xba   :  { %313 = vmatpush1.msra.mxu0 %v266_v6  ;;  %v251_v21 = vld [vmem:[#allocation14 + $0x58] sm:$0xff]  ;;  %v250_v22 = vld [vmem:[#allocation14 + $0x50] sm:$0xff]  ;;  %v249_v23 = vld [vmem:[#allocation14 + $0x48] sm:$0xff] }
  0xbb   :  { %314 = vmatprep.subr.mxu0 %v265_v7  ;;  %v248_v24 = vld [vmem:[#allocation14 + $0x40] sm:$0xff]  ;;  %v247_v25 = vld [vmem:[#allocation14 + $0x38] sm:$0xff]  ;;  %v246_v26 = vld [vmem:[#allocation14 + $0x30] sm:$0xff] }
  0xbc   :  { %315 = vmatpush1.msra.mxu0 %v264_v8  ;;  %v245_v27 = vld [vmem:[#allocation14 + $0x28] sm:$0xff]  ;;  %v244_v28 = vld [vmem:[#allocation14 + $0x20] sm:$0xff]  ;;  %v243_v29 = vld [vmem:[#allocation14 + $0x18] sm:$0xff] }
  0xbd   :  { %316 = vmatprep.subr.mxu0 %v263_v9  ;;  %v242_v30 = vld [vmem:[#allocation14 + $0x10] sm:$0xff]  ;;  %v241_v31 = vld [vmem:[#allocation14 + $0x8] sm:$0xff]  ;;  %v240_v32 = vld [vmem:[#allocation14] sm:$0xff] }
  0xbe   :  { %317 = vmatpush1.msra.mxu0 %v262_v10  ;;  %v306_v33 = vld [vmem:[#allocation10] sm:$0xff]  ;;  %v2773_v35 = vld [vmem:[#allocation5] sm:$0xff]  ;;  %v2786_v39 = vld [vmem:[#allocation17 + $0x70] sm:$0xff] }
  0xbf   :  { %318 = vmatprep.subr.mxu0 %v261_v11  ;;  %v385_v37 = vld [vmem:[#allocation2] sm:$0xff]  ;;  %v2790_v40 = vld [vmem:[#allocation17 + $0x68] sm:$0xff]  ;;  %v2802_v43 = vld [vmem:[#allocation17 + $0x50] sm:$0xff] }
  0xc0   :  { %319 = vmatpush1.msra.mxu0 %v260_v12  ;;  %v2784_v38 = vld [vmem:[#allocation17 + $0x78] sm:$0xff]  ;;  %v2794_v41 = vld [vmem:[#allocation17 + $0x60] sm:$0xff]  ;;  %v2806_v44 = vld [vmem:[#allocation17 + $0x48] sm:$0xff] }
  0xc1   :  { %320 = vmatprep.subr.mxu0 %v259_v13  ;;  %v2798_v42 = vld [vmem:[#allocation17 + $0x58] sm:$0xff]  ;;  %v2810_v45 = vld [vmem:[#allocation17 + $0x40] sm:$0xff]  ;;  %v2818_v47 = vld [vmem:[#allocation17 + $0x30] sm:$0xff] }
  0xc2   :  { %321 = vmatpush1.msra.mxu0 %v258_v14  ;;  %v2814_v46 = vld [vmem:[#allocation17 + $0x38] sm:$0xff]  ;;  %v2822_v48 = vld [vmem:[#allocation17 + $0x28] sm:$0xff]  ;;  %v2826_v49 = vld [vmem:[#allocation17 + $0x20] sm:$0xff] }
  0xc3   :  { %322 = vmatprep.subr.mxu0 %v257_v15  ;;  %v2830_v50 = vld [vmem:[#allocation17 + $0x18] sm:$0xff]  ;;  %v307_v51 = vld [vmem:[#allocation10 + $0x8] sm:$0xff]  ;;  %v2834_v52 = vld [vmem:[#allocation17 + $0x10] sm:$0xff] }
  0xc4   :  { %323 = vmatpush1.msra.mxu0 %v256_v16  ;;  %v2840_v53 = vld [vmem:[#allocation17 + $0x8] sm:$0xff]  ;;  %v2846_v56 = vld [vmem:[#allocation16] ss:$0 sm:$0xff]  ;;  %v303_v63 = vld [vmem:[#allocation19 + $0x70] sm:$0xff] }
  0xc5   :  { %324 = vmatprep.subr.mxu0 %v255_v17  ;;  %v304_v62 = vld [vmem:[#allocation19 + $0x78] sm:$0xff]  ;;  %v302_v1 = vld [vmem:[#allocation19 + $0x68] sm:$0xff]  ;;  %v301_v2 = vld [vmem:[#allocation19 + $0x60] sm:$0xff] }
  0xc6   :  { %325 = vmatpush1.msra.mxu0 %v254_v18  ;;  %v300_v3 = vld [vmem:[#allocation19 + $0x58] sm:$0xff]  ;;  %v299_v4 = vld [vmem:[#allocation19 + $0x50] sm:$0xff]  ;;  %v298_v5 = vld [vmem:[#allocation19 + $0x48] sm:$0xff] }
  0xc7   :  { %326 = vmatprep.subr.mxu0 %v253_v19  ;;  %v297_v6 = vld [vmem:[#allocation19 + $0x40] sm:$0xff]  ;;  %v296_v7 = vld [vmem:[#allocation19 + $0x38] sm:$0xff]  ;;  %v295_v8 = vld [vmem:[#allocation19 + $0x30] sm:$0xff] }
  0xc8   :  { %327 = vmatpush1.msra.mxu0 %v252_v20  ;;  %v294_v9 = vld [vmem:[#allocation19 + $0x28] sm:$0xff]  ;;  %v293_v10 = vld [vmem:[#allocation19 + $0x20] sm:$0xff]  ;;  %v292_v11 = vld [vmem:[#allocation19 + $0x18] sm:$0xff] }
  0xc9   :  { %328 = vmatprep.subr.mxu0 %v251_v21  ;;  %v291_v12 = vld [vmem:[#allocation19 + $0x10] sm:$0xff]  ;;  %v2871_v13 = vld [vmem:[#allocation17] sm:$0xff]  ;;  %v290_v14 = vld [vmem:[#allocation19 + $0x8] sm:$0xff] }
  0xca   :  { %329 = vmatpush1.msra.mxu0 %v250_v22  ;;  %v289_v15 = vld [vmem:[#allocation19] sm:$0xff] }
  0xcb   :  { %330 = vmatprep.subr.mxu0 %v249_v23 }
  0xcc   :  { %331 = vmatpush1.msra.mxu0 %v248_v24  ;;  %v2901_v24 = vld [vmem:[%s3038_s12] ss:$0 sm:$0xff] }
  0xcd   :  { %332 = vmatprep.subr.mxu0 %v247_v25 }
  0xce   :  { %333 = vmatpush1.msra.mxu0 %v246_v26 }
  0xcf   :  { %334 = vmatprep.subr.mxu0 %v245_v27 }
  0xd0   :  { %335 = vmatpush1.msra.mxu0 %v244_v28 }
  0xd1   :  { %336 = vmatprep.subr.mxu0 %v243_v29  ;;  %v387_v29 = vld [vmem:[%s3031_s5] sm:$0xff] }
  0xd2   :  { %337 = vmatpush1.msra.mxu0 %v242_v30  ;;  %v904_v30 = vld [vmem:[#allocation8] sm:$0xff] }
  0xd3   :  { %338 = vmatprep.subr.mxu0 %v241_v31  ;;  %v903_v31 = vld [vmem:[#allocation7] sm:$0xff] }
  0xd4   :  { %339 = vmatpush1.msra.mxu0 %v240_v32 }
  0xd5   :  { %373 = vmatmul.mubr.f32.vlgmr.msra.gmra.mxu0 %v306_v33  ;;  %2002 = vmatprep.subr.mxu0 %v2601_v0 }
  0xd6   :  { %378 = vmatprep.mubr.f32.mxu0 %v2601_v0  ;;  %2003 = vmatpush3.msra.mxu0 %v2784_v38 }
  0xd7   :  { %2004 = vmatprep.subr.mxu0 %v2601_v0 }
  0xd8   :  { %2005 = vmatpush3.msra.mxu0 %v2786_v39 }
  0xd9   :  { %2006 = vmatprep.subr.mxu0 %v2601_v0  ;;  %379 = vmatmul.mubr.f32.gmra.mxu0 %v307_v51 }
  0xda   :  { %2007 = vmatpush3.msra.mxu0 %v2790_v40  ;;  %2034 = vmatprep.mubr.msk.f32.mxu0 %vm2602_vm0, %v2601_v0 }
  0xdb   :  { %2008 = vmatprep.subr.mxu0 %v2601_v0 }
  0xdc   :  { %2009 = vmatpush3.msra.mxu0 %v2794_v41 }
  0xdd   :  { %2010 = vmatprep.subr.mxu0 %v2601_v0 }
  0xde   :  { %2011 = vmatpush3.msra.mxu0 %v2798_v42 }
  0xdf   :  { %2012 = vmatprep.subr.mxu0 %v2601_v0 }
  0xe0   :  { %2013 = vmatpush3.msra.mxu0 %v2802_v43 }
  0xe1   :  { %2014 = vmatprep.subr.mxu0 %v2601_v0 }
  0xe2   :  { %2015 = vmatpush3.msra.mxu0 %v2806_v44 }
  0xe3   :  { %2016 = vmatprep.subr.mxu0 %v2601_v0 }
  0xe4   :  { %2017 = vmatpush3.msra.mxu0 %v2810_v45 }
  0xe5   :  { %2018 = vmatprep.subr.mxu0 %v2601_v0 }
  0xe6   :  { %2019 = vmatpush3.msra.mxu0 %v2814_v46 }
  0xe7   :  { %2020 = vmatprep.subr.mxu0 %v2601_v0 }
  0xe8   :  { %2021 = vmatpush3.msra.mxu0 %v2818_v47 }
  0xe9   :  { %2022 = vmatprep.subr.mxu0 %v2601_v0 }
  0xea   :  { %2023 = vmatpush3.msra.mxu0 %v2822_v48 }
  0xeb   :  { %2024 = vmatprep.subr.mxu0 %v2601_v0 }
  0xec   :  { %2025 = vmatpush3.msra.mxu0 %v2826_v49 }
  0xed   :  { %2026 = vmatprep.subr.mxu0 %v2601_v0 }
  0xee   :  { %2027 = vmatpush3.msra.mxu0 %v2830_v50 }
  0xef   :  { %2028 = vmatprep.subr.mxu0 %v2601_v0 }
  0xf0   :  { %2029 = vmatpush3.msra.mxu0 %v2834_v52 }
  0xf1   :  { %2030 = vmatprep.subr.mxu0 %v2601_v0 }
  0xf2   :  { %2031 = vmatpush3.msra.mxu0 %v2840_v53 }
  0xf3   :  { %2032 = vmatprep.subr.mxu0 %v2601_v0 }
  0xf4   :  { %2033 = vmatpush3.msra.mxu0 %v2871_v13 }
  0xf5   :  { %2062 = vmatprep.subr.mxu0 %v2601_v0 }
 0x195   :  { %v374_v34 = vpop.f32.mrf.mxu0 }
 0x197   :  { %v376_v36 = vpop.f32.mrf.mxu0 }
 0x198   :  { %1948 = vmatpush3.msra.mxu1 %v376_v36 }
 0x199   :  { %1950 = vmatmul.mubr.msk.f32.vlgmr.msra.gmra.mxu1 %vm388_vm1, %v2773_v35  ;;  %1952 = vmatprep.subr.mxu1 %v2601_v0  ;;  %v380_v20 = vpop.f32.mrf.mxu0 }
 0x19a   :  { %1953 = vmatpush3.msra.mxu1 %v374_v34  ;;  %1954 = vmatprep.mubr.msk.f32.mxu1 %vm2602_vm0, %v2601_v0 }
 0x19b   :  { %1957 = vmatprep.subr.mxu1 %v2601_v0  ;;  %v382_v21 = vpop.f32.mrf.mxu0 }
 0x19d   :  { %1955 = vmatmul.mubr.msk.f32.vlgmr.msra.gmra.mxu1 %vm388_vm1, %v385_v37 }
 0x19e   :  { %1959 = vmatprep.mubr.msk.f32.mxu1 %vm2602_vm0, %v2601_v0 }
 0x259   :  { %v458_v54 = vpop.f32.mrf.mxu1 }
 0x25b   :  { %v1951_v55 = vpop.f32.mrf.mxu1 }
 0x25d   :  { %v531_v57 = vpop.f32.mrf.mxu1 }
 0x25e   :  { %v532_v58 = vadd.f32 %v531_v57, %v458_v54  ;;  %v1412_v57 = vld [vmem:[#allocation20 + $0x18] sm:$0xff] }
 0x25f   :  { %v1956_v59 = vpop.f32.mrf.mxu1 }
 0x260   :  { %v541_v60 = vadd.f32 %v2846_v56, %v532_v58  ;;  %v1411_v58 = vld [vmem:[#allocation20 + $0x10] sm:$0xff]  ;;  %v1410_v59 = vld [vmem:[#allocation20 + $0x8] sm:$0xff] }
 0x262   :  { %v542_v61 = vmax.f32 %v541_v60, 0.0  ;;  %v1409_v60 = vld [vmem:[#allocation20] sm:$0xff] }
 0x264   :  { %1958 = vmatpush3.msra.mxu1 %v542_v61 }
 0x265   :  { %1960 = vmatmul.mubr.msk.f32.vlgmr.msra.gmra.mxu1 %vm388_vm1, %v385_v37  ;;  %1962 = vmatprep.subr.mxu1 %v2601_v0 }
 0x266   :  { %1963 = vmatpush3.msra.mxu1 %v542_v61  ;;  %1964 = vmatprep.mubr.msk.f32.mxu1 %vm2602_vm0, %v2601_v0  ;;  %v1408_v61 = vld [vmem:[#allocation13] sm:$0xff] }
 0x267   :  { %1967 = vmatprep.subr.mxu1 %v2601_v0 }
 0x269   :  { %1965 = vmatmul.mubr.msk.f32.vlgmr.msra.gmra.mxu1 %vm388_vm1, %v2773_v35 }
 0x26a   :  { %1968 = vmatpush3.msra.mxu1 %v304_v62  ;;  %1999 = vmatprep.mubr.msk.f32.mxu1 %vm2602_vm0, %v2601_v0 }
 0x26b   :  { %1969 = vmatprep.subr.mxu1 %v2601_v0 }
 0x26c   :  { %1970 = vmatpush3.msra.mxu1 %v303_v63 }
 0x26d   :  { %1971 = vmatprep.subr.mxu1 %v2601_v0 }
 0x26e   :  { %1972 = vmatpush3.msra.mxu1 %v302_v1 }
 0x26f   :  { %1973 = vmatprep.subr.mxu1 %v2601_v0 }
 0x270   :  { %1974 = vmatpush3.msra.mxu1 %v301_v2 }
 0x271   :  { %1975 = vmatprep.subr.mxu1 %v2601_v0 }
 0x272   :  { %1976 = vmatpush3.msra.mxu1 %v300_v3 }
 0x273   :  { %1977 = vmatprep.subr.mxu1 %v2601_v0 }
 0x274   :  { %1978 = vmatpush3.msra.mxu1 %v299_v4 }
 0x275   :  { %1979 = vmatprep.subr.mxu1 %v2601_v0 }
 0x276   :  { %1980 = vmatpush3.msra.mxu1 %v298_v5 }
 0x277   :  { %1981 = vmatprep.subr.mxu1 %v2601_v0 }
 0x278   :  { %1982 = vmatpush3.msra.mxu1 %v297_v6 }
 0x279   :  { %1983 = vmatprep.subr.mxu1 %v2601_v0 }
 0x27a   :  { %1984 = vmatpush3.msra.mxu1 %v296_v7 }
 0x27b   :  { %1985 = vmatprep.subr.mxu1 %v2601_v0 }
 0x27c   :  { %1986 = vmatpush3.msra.mxu1 %v295_v8 }
 0x27d   :  { %1987 = vmatprep.subr.mxu1 %v2601_v0 }
 0x27e   :  { %1988 = vmatpush3.msra.mxu1 %v294_v9 }
 0x27f   :  { %1989 = vmatprep.subr.mxu1 %v2601_v0 }
 0x280   :  { %1990 = vmatpush3.msra.mxu1 %v293_v10 }
 0x281   :  { %1991 = vmatprep.subr.mxu1 %v2601_v0 }
 0x282   :  { %1992 = vmatpush3.msra.mxu1 %v292_v11 }
 0x283   :  { %1993 = vmatprep.subr.mxu1 %v2601_v0 }
 0x284   :  { %1994 = vmatpush3.msra.mxu1 %v291_v12 }
 0x285   :  { %1995 = vmatprep.subr.mxu1 %v2601_v0 }
 0x286   :  { %1996 = vmatpush3.msra.mxu1 %v290_v14 }
 0x287   :  { %1997 = vmatprep.subr.mxu1 %v2601_v0 }
 0x288   :  { %1998 = vmatpush3.msra.mxu1 %v289_v15 }
 0x289   :  { %2037 = vmatprep.subr.mxu1 %v2601_v0 }
 0x325   :  { %v609_v16 = vpop.f32.mrf.mxu1 }
 0x326   :  { %2035 = vmatmul.mubr.f32.vlgmr.msra.gmra.mxu0 %v609_v16  ;;  %v1508_v16 = vld [vmem:[#allocation23 + $0x28] sm:$0xff] }
 0x327   :  { %v1961_v17 = vpop.f32.mrf.mxu1  ;;  %2063 = vmatpush3.msra.mxu0 %v304_v62  ;;  %2094 = vmatprep.mubr.msk.f32.mxu0 %vm2602_vm0, %v2601_v0 }
 0x328   :  { %2064 = vmatprep.subr.mxu0 %v2601_v0  ;;  %v1507_v17 = vld [vmem:[#allocation23 + $0x20] sm:$0xff] }
 0x329   :  { %v679_v18 = vpop.f32.mrf.mxu1  ;;  %2065 = vmatpush3.msra.mxu0 %v303_v63 }
 0x32a   :  { %2000 = vmatmul.mubr.f32.vlgmr.msra.gmra.mxu1 %v679_v18  ;;  %2066 = vmatprep.subr.mxu0 %v2601_v0  ;;  %v1817_v18 = vld [vmem:[#allocation22] ss:$0 sm:$0xff] }
 0x32b   :  { %v1966_v19 = vpop.f32.mrf.mxu1  ;;  %2039 = vmatprep.mubr.msk.f32.mxu1 %vm2602_vm0, %v2601_v0  ;;  %2067 = vmatpush3.msra.mxu0 %v302_v1 }
 0x32c   :  { %2068 = vmatprep.subr.mxu0 %v2601_v0  ;;  %v1506_v19 = vld [vmem:[#allocation23 + $0x18] sm:$0xff] }
 0x32d   :  { %2069 = vmatpush3.msra.mxu0 %v301_v2 }
 0x32e   :  { %2070 = vmatprep.subr.mxu0 %v2601_v0 }
 0x32f   :  { %2071 = vmatpush3.msra.mxu0 %v300_v3 }
 0x330   :  { %2072 = vmatprep.subr.mxu0 %v2601_v0 }
 0x331   :  { %2073 = vmatpush3.msra.mxu0 %v299_v4 }
 0x332   :  { %2074 = vmatprep.subr.mxu0 %v2601_v0 }
 0x333   :  { %2075 = vmatpush3.msra.mxu0 %v298_v5  ;;  %v905_v5 = vld [vmem:[#allocation11] sm:$0xff] }
 0x334   :  { %2076 = vmatprep.subr.mxu0 %v2601_v0 }
 0x335   :  { %2077 = vmatpush3.msra.mxu0 %v297_v6  ;;  %v1518_v6 = vld [vmem:[#allocation23 + $0x78] sm:$0xff] }
 0x336   :  { %2078 = vmatprep.subr.mxu0 %v2601_v0 }
 0x337   :  { %2079 = vmatpush3.msra.mxu0 %v296_v7  ;;  %v1517_v7 = vld [vmem:[#allocation23 + $0x70] sm:$0xff] }
 0x338   :  { %2080 = vmatprep.subr.mxu0 %v2601_v0 }
 0x339   :  { %2081 = vmatpush3.msra.mxu0 %v295_v8  ;;  %v1516_v8 = vld [vmem:[#allocation23 + $0x68] sm:$0xff] }
 0x33a   :  { %2082 = vmatprep.subr.mxu0 %v2601_v0 }
 0x33b   :  { %2083 = vmatpush3.msra.mxu0 %v294_v9  ;;  %v1515_v9 = vld [vmem:[#allocation23 + $0x60] sm:$0xff] }
 0x33c   :  { %2084 = vmatprep.subr.mxu0 %v2601_v0 }
 0x33d   :  { %2085 = vmatpush3.msra.mxu0 %v293_v10  ;;  %v1514_v10 = vld [vmem:[#allocation23 + $0x58] sm:$0xff] }
 0x33e   :  { %2086 = vmatprep.subr.mxu0 %v2601_v0 }
 0x33f   :  { %2087 = vmatpush3.msra.mxu0 %v292_v11  ;;  %v1513_v11 = vld [vmem:[#allocation23 + $0x50] sm:$0xff] }
 0x340   :  { %2088 = vmatprep.subr.mxu0 %v2601_v0 }
 0x341   :  { %2089 = vmatpush3.msra.mxu0 %v291_v12  ;;  %v1512_v12 = vld [vmem:[#allocation23 + $0x48] sm:$0xff] }
 0x342   :  { %2090 = vmatprep.subr.mxu0 %v2601_v0 }
 0x343   :  { %2091 = vmatpush3.msra.mxu0 %v290_v14  ;;  %v1510_v14 = vld [vmem:[#allocation23 + $0x38] sm:$0xff] }
 0x344   :  { %2092 = vmatprep.subr.mxu0 %v2601_v0 }
 0x345   :  { %2093 = vmatpush3.msra.mxu0 %v289_v15  ;;  %v1509_v15 = vld [vmem:[#allocation23 + $0x30] sm:$0xff] }
 0x346   :  { %2132 = vmatprep.subr.mxu0 %v2601_v0 }
 0x3e6   :  { %v819_v22 = vpop.f32.mrf.mxu0 }
 0x3e8   :  { %v2036_v23 = vpop.f32.mrf.mxu0 }
 0x3ea   :  { %v749_v25 = vpop.f32.mrf.mxu1 }
 0x3eb   :  { %v820_v26 = vadd.f32 %v819_v22, %v749_v25  ;;  %v1505_v22 = vld [vmem:[#allocation23 + $0x10] sm:$0xff] }
 0x3ec   :  { %v2001_v27 = vpop.f32.mrf.mxu1 }
 0x3ed   :  { %v829_v28 = vadd.f32 %v2901_v24, %v820_v26  ;;  %v1503_v26 = vld [vmem:[#allocation23] sm:$0xff] }
 0x3ee   :  { %v1596_v27 = vld [vmem:[%s3043_s17] sm:$0xff] }
 0x3ef   :  { %2038 = vmatpush3.msra.mxu1 %v829_v28  ;;  %v1597_v28 = vld [vmem:[%s3044_s18] sm:$0xff] }
 0x3f0   :  { %2040 = vmatmul.mubr.msk.f32.vlgmr.msra.gmra.mxu1 %vm388_vm1, %v387_v29  ;;  %2042 = vmatprep.subr.mxu1 %v2601_v0 }
 0x3f1   :  { %2043 = vmatpush3.msra.mxu1 %v382_v21  ;;  %2044 = vmatprep.mubr.msk.f32.mxu1 %vm2602_vm0, %v2601_v0 }
 0x3f2   :  { %2047 = vmatprep.subr.mxu1 %v2601_v0 }
 0x3f4   :  { %2045 = vmatmul.mubr.msk.f32.vlgmr.msra.gmra.mxu1 %vm388_vm1, %v904_v30 }
 0x3f5   :  { %2048 = vmatpush3.msra.mxu1 %v380_v20  ;;  %2049 = vmatprep.mubr.msk.f32.mxu1 %vm2602_vm0, %v2601_v0 }
 0x3f6   :  { %2052 = vmatprep.subr.mxu1 %v2601_v0 }
 0x3f8   :  { %2050 = vmatmul.mubr.msk.f32.vlgmr.msra.gmra.mxu1 %vm388_vm1, %v903_v31 }
 0x3f9   :  { %2054 = vmatprep.mubr.msk.f32.mxu1 %vm2602_vm0, %v2601_v0 }
 0x4b0   :  { %v2919_v32 = vpop.f32.mrf.mxu1 }
 0x4b2   :  { %v2041_v33 = vpop.f32.mrf.mxu1 }
 0x4b4   :  { %v975_v34 = vpop.f32.mrf.mxu1 }
 0x4b6   :  { %v2046_v35 = vpop.f32.mrf.mxu1 }
 0x4b8   :  { %v1048_v36 = vpop.f32.mrf.mxu1 }
 0x4b9   :  { %v1049_v37 = vadd.f32 %v1048_v36, %v975_v34 }
 0x4ba   :  { %v2051_v51 = vpop.f32.mrf.mxu1 }
 0x4bb   :  { %v1052_v54 = vadd.f32 %v2846_v56, %v1049_v37  ;;  %v1413_v56 = vld [vmem:[#allocation20 + $0x20] sm:$0xff] }
 0x4bd   :  { %v1053_v55 = vmax.f32 %v1052_v54, 0.0 }
 0x4bf   :  { %2053 = vmatpush3.msra.mxu1 %v1053_v55 }
 0x4c0   :  { %2055 = vmatmul.mubr.msk.f32.vlgmr.msra.gmra.mxu1 %vm388_vm1, %v903_v31  ;;  %2057 = vmatprep.subr.mxu1 %v2601_v0  ;;  %v1818_v31 = vld [vmem:[%s3042_s16] ss:$0 sm:$0xff]  ;;  %s2603_s16 = smov [#allocation25]  }
 0x4c1   :  { %2058 = vmatpush3.msra.mxu1 %v1053_v55  ;;  %2059 = vmatprep.mubr.msk.f32.mxu1 %vm2602_vm0, %v2601_v0  ;;  %s1775_s17 = sshll.u32 %s2603_s16, 4  ;;  %s1776_s17 = int_to_ptr.vmem [resolvable:$true] %s1775_s17 }
 0x4c2   :  { %2097 = vmatprep.subr.mxu1 %v2601_v0  ;;  %s2523_s18 = scalar_lea.vmem %s1776_s17, 128  ;;  %p2528_p1 = scmp.lt.s32.totalorder %s1776_s17, %s1776_s17 }
 0x4c3   :  { %p2524_p0 = scmp.ne.s32.totalorder %s1776_s17, %s2523_s18  ;;  %p2529_p2 = scmp.lt.s32.totalorder %s2523_s18, %s2523_s18 }
 0x4c4   :  { %2060 = vmatmul.mubr.msk.f32.vlgmr.msra.gmra.mxu1 %vm388_vm1, %v904_v30 }
 0x4c5   :  { %2098 = vmatpush3.msra.mxu1 %v2784_v38  ;;  %2129 = vmatprep.mubr.msk.f32.mxu1 %vm2602_vm0, %v2601_v0  ;;  %v1424_v38 = vld [vmem:[#allocation20 + $0x78] sm:$0xff]  ;;  %p2530_p3 = por %p2529_p2, %p2528_p1 }
 0x4c6   :  { %2099 = vmatprep.subr.mxu1 %v2601_v0 }
 0x4c7   :  { %2100 = vmatpush3.msra.mxu1 %v2786_v39  ;;  %p2531_p4 = pnand %p2530_p3, %p2524_p0 }
 0x4c8   :  { %2101 = vmatprep.subr.mxu1 %v2601_v0 }
 0x4c9   :  { %2102 = vmatpush3.msra.mxu1 %v2790_v40  ;;  %v1423_v40 = vld [vmem:[#allocation20 + $0x70] sm:$0xff] }
 0x4ca   :  { %2103 = vmatprep.subr.mxu1 %v2601_v0 }
 0x4cb   :  { %2104 = vmatpush3.msra.mxu1 %v2794_v41 }
 0x4cc   :  { %2105 = vmatprep.subr.mxu1 %v2601_v0 }
 0x4cd   :  { %2106 = vmatpush3.msra.mxu1 %v2798_v42  ;;  %v1422_v42 = vld [vmem:[#allocation20 + $0x68] sm:$0xff] }
 0x4ce   :  { %2107 = vmatprep.subr.mxu1 %v2601_v0 }
 0x4cf   :  { %2108 = vmatpush3.msra.mxu1 %v2802_v43 }
 0x4d0   :  { %2109 = vmatprep.subr.mxu1 %v2601_v0 }
 0x4d1   :  { %2110 = vmatpush3.msra.mxu1 %v2806_v44  ;;  %v1421_v44 = vld [vmem:[#allocation20 + $0x60] sm:$0xff] }
 0x4d2   :  { %2111 = vmatprep.subr.mxu1 %v2601_v0 }
 0x4d3   :  { %2112 = vmatpush3.msra.mxu1 %v2810_v45 }
 0x4d4   :  { %2113 = vmatprep.subr.mxu1 %v2601_v0 }
 0x4d5   :  { %2114 = vmatpush3.msra.mxu1 %v2814_v46  ;;  %v1420_v46 = vld [vmem:[#allocation20 + $0x58] sm:$0xff] }
 0x4d6   :  { %2115 = vmatprep.subr.mxu1 %v2601_v0 }
 0x4d7   :  { %2116 = vmatpush3.msra.mxu1 %v2818_v47  ;;  %v1419_v47 = vld [vmem:[#allocation20 + $0x50] sm:$0xff] }
 0x4d8   :  { %2117 = vmatprep.subr.mxu1 %v2601_v0 }
 0x4d9   :  { %2118 = vmatpush3.msra.mxu1 %v2822_v48  ;;  %v1418_v48 = vld [vmem:[#allocation20 + $0x48] sm:$0xff] }
 0x4da   :  { %2119 = vmatprep.subr.mxu1 %v2601_v0 }
 0x4db   :  { %2120 = vmatpush3.msra.mxu1 %v2826_v49  ;;  %v1417_v49 = vld [vmem:[#allocation20 + $0x40] sm:$0xff] }
 0x4dc   :  { %2121 = vmatprep.subr.mxu1 %v2601_v0 }
 0x4dd   :  { %2122 = vmatpush3.msra.mxu1 %v2830_v50  ;;  %v1416_v50 = vld [vmem:[#allocation20 + $0x38] sm:$0xff] }
 0x4de   :  { %2123 = vmatprep.subr.mxu1 %v2601_v0 }
 0x4df   :  { %2124 = vmatpush3.msra.mxu1 %v2834_v52  ;;  %v1415_v52 = vld [vmem:[#allocation20 + $0x30] sm:$0xff] }
 0x4e0   :  { %2125 = vmatprep.subr.mxu1 %v2601_v0 }
 0x4e1   :  { %2126 = vmatpush3.msra.mxu1 %v2840_v53  ;;  %v1414_v53 = vld [vmem:[#allocation20 + $0x28] sm:$0xff] }
 0x4e2   :  { %2127 = vmatprep.subr.mxu1 %v2601_v0 }
 0x4e3   :  { %2128 = vmatpush3.msra.mxu1 %v2871_v13  ;;  %v1511_v13 = vld [vmem:[#allocation23 + $0x40] sm:$0xff] }
 0x4e4   :  { %2137 = vmatprep.subr.mxu1 %v2601_v0 }
 0x580   :  { %v1120_v39 = vpop.f32.mrf.mxu1 }
 0x581   :  { %2130 = vmatmul.mubr.f32.vlgmr.msra.gmra.mxu1 %v1120_v39 }
 0x582   :  { %v2056_v41 = vpop.f32.mrf.mxu1  ;;  %2138 = vmatpush3.msra.mxu1 %v1424_v38  ;;  %2169 = vmatprep.mubr.msk.f32.mxu1 %vm2602_vm0, %v2601_v0 }
 0x583   :  { %2139 = vmatprep.subr.mxu1 %v2601_v0 }
 0x584   :  { %v1190_v43 = vpop.f32.mrf.mxu1  ;;  %2140 = vmatpush3.msra.mxu1 %v1423_v40 }
 0x585   :  { %2095 = vmatmul.mubr.f32.vlgmr.msra.gmra.mxu0 %v1190_v43  ;;  %2141 = vmatprep.subr.mxu1 %v2601_v0 }
 0x586   :  { %v2061_v45 = vpop.f32.mrf.mxu1  ;;  %2142 = vmatpush3.msra.mxu1 %v1422_v42  ;;  %2134 = vmatprep.mubr.msk.f32.mxu0 %vm2602_vm0, %v2601_v0 }
 0x587   :  { %2143 = vmatprep.subr.mxu1 %v2601_v0 }
 0x588   :  { %2144 = vmatpush3.msra.mxu1 %v1421_v44 }
 0x589   :  { %2145 = vmatprep.subr.mxu1 %v2601_v0 }
 0x58a   :  { %2146 = vmatpush3.msra.mxu1 %v1420_v46 }
 0x58b   :  { %2147 = vmatprep.subr.mxu1 %v2601_v0 }
 0x58c   :  { %2148 = vmatpush3.msra.mxu1 %v1419_v47 }
 0x58d   :  { %2149 = vmatprep.subr.mxu1 %v2601_v0 }
 0x58e   :  { %2150 = vmatpush3.msra.mxu1 %v1418_v48 }
 0x58f   :  { %2151 = vmatprep.subr.mxu1 %v2601_v0 }
 0x590   :  { %2152 = vmatpush3.msra.mxu1 %v1417_v49 }
 0x591   :  { %2153 = vmatprep.subr.mxu1 %v2601_v0 }
 0x592   :  { %2154 = vmatpush3.msra.mxu1 %v1416_v50 }
 0x593   :  { %2155 = vmatprep.subr.mxu1 %v2601_v0 }
 0x594   :  { %2156 = vmatpush3.msra.mxu1 %v1415_v52 }
 0x595   :  { %2157 = vmatprep.subr.mxu1 %v2601_v0 }
 0x596   :  { %2158 = vmatpush3.msra.mxu1 %v1414_v53 }
 0x597   :  { %2159 = vmatprep.subr.mxu1 %v2601_v0 }
 0x598   :  { %2160 = vmatpush3.msra.mxu1 %v1413_v56 }
 0x599   :  { %2161 = vmatprep.subr.mxu1 %v2601_v0 }
 0x59a   :  { %2162 = vmatpush3.msra.mxu1 %v1412_v57 }
 0x59b   :  { %2163 = vmatprep.subr.mxu1 %v2601_v0 }
 0x59c   :  { %2164 = vmatpush3.msra.mxu1 %v1411_v58 }
 0x59d   :  { %2165 = vmatprep.subr.mxu1 %v2601_v0 }
 0x59e   :  { %2166 = vmatpush3.msra.mxu1 %v1410_v59 }
 0x59f   :  { %2167 = vmatprep.subr.mxu1 %v2601_v0 }
 0x5a0   :  { %2168 = vmatpush3.msra.mxu1 %v1409_v60 }
 0x5a1   :  { %2170 = vmatmul.mubr.f32.vlgmr.msra.gmra.mxu1 %v1408_v61  ;;  %2207 = vmatprep.subr.mxu1 %v2601_v0 }
 0x5a2   :  { %2209 = vmatprep.mubr.msk.f32.mxu1 %vm2602_vm0, %v2601_v0 }
 0x641   :  { %v1330_v62 = vpop.f32.mrf.mxu1 }
 0x643   :  { %v2131_v63 = vpop.f32.mrf.mxu1 }
 0x645   :  { %v1260_v1 = vpop.f32.mrf.mxu0 }
 0x646   :  { %v1331_v2 = vadd.f32 %v1330_v62, %v1260_v1 }
 0x647   :  { %v2096_v3 = vpop.f32.mrf.mxu0 }
 0x648   :  { %v1334_v4 = vadd.f32 %v2901_v24, %v1331_v2  ;;  %v1504_v24 = vld [vmem:[#allocation23 + $0x8] sm:$0xff] }
 0x64a   :  { %2133 = vmatpush3.msra.mxu0 %v1334_v4 }
 0x64b   :  { %2135 = vmatmul.mubr.msk.f32.vlgmr.msra.gmra.mxu0 %vm388_vm1, %v905_v5  ;;  %2172 = vmatprep.subr.mxu0 %v2601_v0 }
 0x64c   :  { %2173 = vmatpush3.msra.mxu0 %v1518_v6  ;;  %2204 = vmatprep.mubr.msk.f32.mxu0 %vm2602_vm0, %v2601_v0 }
 0x64d   :  { %2174 = vmatprep.subr.mxu0 %v2601_v0 }
 0x64e   :  { %2175 = vmatpush3.msra.mxu0 %v1517_v7 }
 0x64f   :  { %2176 = vmatprep.subr.mxu0 %v2601_v0 }
 0x650   :  { %2177 = vmatpush3.msra.mxu0 %v1516_v8 }
 0x651   :  { %2178 = vmatprep.subr.mxu0 %v2601_v0 }
 0x652   :  { %2179 = vmatpush3.msra.mxu0 %v1515_v9 }
 0x653   :  { %2180 = vmatprep.subr.mxu0 %v2601_v0 }
 0x654   :  { %2181 = vmatpush3.msra.mxu0 %v1514_v10 }
 0x655   :  { %2182 = vmatprep.subr.mxu0 %v2601_v0 }
 0x656   :  { %2183 = vmatpush3.msra.mxu0 %v1513_v11 }
 0x657   :  { %2184 = vmatprep.subr.mxu0 %v2601_v0 }
 0x658   :  { %2185 = vmatpush3.msra.mxu0 %v1512_v12 }
 0x659   :  { %2186 = vmatprep.subr.mxu0 %v2601_v0 }
 0x65a   :  { %2187 = vmatpush3.msra.mxu0 %v1511_v13 }
 0x65b   :  { %2188 = vmatprep.subr.mxu0 %v2601_v0 }
 0x65c   :  { %2189 = vmatpush3.msra.mxu0 %v1510_v14 }
 0x65d   :  { %2190 = vmatprep.subr.mxu0 %v2601_v0 }
 0x65e   :  { %2191 = vmatpush3.msra.mxu0 %v1509_v15 }
 0x65f   :  { %2192 = vmatprep.subr.mxu0 %v2601_v0 }
 0x660   :  { %2193 = vmatpush3.msra.mxu0 %v1508_v16 }
 0x661   :  { %2194 = vmatprep.subr.mxu0 %v2601_v0  ;;  %v1498_v20 = vpop.f32.mrf.mxu1 }
 0x662   :  { %2195 = vmatpush3.msra.mxu0 %v1507_v17  ;;  %v1499_v21 = vadd.f32 %v1817_v18, %v1498_v20 }
 0x663   :  { %2196 = vmatprep.subr.mxu0 %v2601_v0  ;;  %v2171_v23 = vpop.f32.mrf.mxu1 }
 0x664   :  { %2197 = vmatpush3.msra.mxu0 %v1506_v19  ;;  %v1502_v25 = vmax.f32 %v1499_v21, 0.0 }
 0x665   :  { %2198 = vmatprep.subr.mxu0 %v2601_v0 }
 0x666   :  { %2199 = vmatpush3.msra.mxu0 %v1505_v22 }
 0x667   :  { %2200 = vmatprep.subr.mxu0 %v2601_v0 }
 0x668   :  { %2201 = vmatpush3.msra.mxu0 %v1504_v24 }
 0x669   :  { %2202 = vmatprep.subr.mxu0 %v2601_v0 }
 0x66a   :  { %2203 = vmatpush3.msra.mxu0 %v1503_v26 }
 0x66b   :  { %2205 = vmatmul.mubr.f32.vlgmr.msra.gmra.mxu0 %v1502_v25  ;;  %2212 = vmatprep.subr.mxu0 %v2601_v0 }
 0x66c   :  { %2213 = vmatpush3.msra.mxu0 %v2919_v32  ;;  %2214 = vmatprep.mubr.msk.f32.mxu0 %vm2602_vm0, %v2601_v0 }
 0x66f   :  { %2215 = vmatmul.mubr.msk.f32.vlgmr.msra.gmra.mxu0 %vm388_vm1, %v1596_v27 }
 0x70b   :  { %v1404_v29 = vpop.f32.mrf.mxu0 }
 0x70c   :  { %2208 = vmatpush3.msra.mxu1 %v1404_v29 }
 0x70d   :  { %v2136_v30 = vpop.f32.mrf.mxu0  ;;  %2210 = vmatmul.mubr.msk.f32.vlgmr.msra.gmra.mxu1 %vm388_vm1, %v1597_v28 }
 0x72b   :  { %v1592_v0 = vpop.f32.mrf.mxu0 }
 0x72c   :  { %v1593_v33 = vadd.f32 %v1818_v31, %v1592_v0 }
 0x72d   :  { %v2206_v34 = vpop.f32.mrf.mxu0 }
 0x72e   :  { %v1671_v35 = vadd.f32 %v1593_v33, %v2919_v32 }
 0x72f   :  { %v1742_v51 = vpop.f32.mrf.mxu0 }
 0x730   :  { %v1672_v36 = vsub.f32 %v1671_v35, %v1404_v29  ;;  %v1743_v54 = vadd.f32 %v1742_v51, %v1593_v33 }
 0x731   :  { %v2216_v55 = vpop.f32.mrf.mxu0 }
 0x732   :  { %v1747_v37 = vmul.f32 %v1672_v36, %v1672_v36 }
 0x734   :  { %1748 = vadd.xlane.f32.xlu0 %v1747_v37 }
 0x7bd   :  { %v1749_v38 = vpop.xlane.xlu0 %1748 }
 0x7be   :  { %2239 = vrsqrt.f32 %v1749_v38  ;;  %vm1752_vm2 = vcmp.eq.f32.partialorder %v1749_v38, inf  ;;  %v1755_v42 = vand.u32 2147483648, %v1749_v38  ;;  %vm1754_vm3 = vcmp.eq.f32.partialorder %v1749_v38, 0.0 }
 0x7cb   :  { %v2240_v39 = vpop.eup %2239 }
 0x7cc   :  { %v1751_v40 = vmul.f32 %v2240_v39, %v1749_v38 }
 0x7cd   :  { %v1667_v41 = vpop.f32.mrf.mxu1 }
 0x7ce   :  { %v1746_v43 = vsub.f32 %v1743_v54, %v1667_v41  ;;  %v1753_v44 = vsel %vm1752_vm2, %v1749_v38, %v1751_v40 }
 0x7cf   :  { %v2211_v45 = vpop.f32.mrf.mxu1  ;;  %v1756_v46 = vsel %vm1754_vm3, %v1755_v42, %v1753_v44 }
 0x7d0   :  { %v1757_v47 = vmul.f32 %v1746_v43, %v1746_v43  ;;  %1767 = vst [vmem:[#allocation25] sm:$0xff] %v1756_v46 }
 0x7d2   :  { %1758 = vadd.xlane.f32.xlu0 %v1757_v47 }
 0x7d3   :  { %2534 = shalt.err (!%p2531_p4)
}
 0x7d4   :  { %1778 = dma.vmem_to_hbm [thread:$0]  %s1776_s17, 128, %s3045_s19, [#allocation4]  }
 0x7d5   :  { %s2604_s1 = smov [#allocation26]  }
 0x7d6   :  { %s1785_s7 = sshll.u32 %s2604_s1, 4  ;;  %s1786_s7 = int_to_ptr.vmem [resolvable:$true] %s1785_s7 }
 0x7d7   :  { %s2543_s22 = scalar_lea.vmem %s1786_s7, 128  ;;  %p2548_p6 = scmp.lt.s32.totalorder %s1786_s7, %s1786_s7 }
 0x7d8   :  { %p2544_p5 = scmp.ne.s32.totalorder %s1786_s7, %s2543_s22  ;;  %p2549_p7 = scmp.lt.s32.totalorder %s2543_s22, %s2543_s22 }
 0x7da   :  { %p2550_p8 = por %p2549_p7, %p2548_p6 }
 0x7dc   :  { %p2551_p9 = pnand %p2550_p8, %p2544_p5 }
 0x85b   :  { %v1759_v32 = vpop.xlane.xlu0 %1758 }
 0x85c   :  { %2241 = vrsqrt.f32 %v1759_v32  ;;  %vm1762_vm4 = vcmp.eq.f32.partialorder %v1759_v32, inf  ;;  %v1765_v50 = vand.u32 2147483648, %v1759_v32  ;;  %vm1764_vm5 = vcmp.eq.f32.partialorder %v1759_v32, 0.0 }
 0x869   :  { %v2242_v48 = vpop.eup %2241 }
 0x86a   :  { %v1761_v49 = vmul.f32 %v2242_v48, %v1759_v32 }
 0x86c   :  { %v1763_v52 = vsel %vm1762_vm4, %v1759_v32, %v1761_v49 }
 0x86d   :  { %v1766_v53 = vsel %vm1764_vm5, %v1765_v50, %v1763_v52 }
 0x86e   :  { %1768 = vst [vmem:[#allocation26] sm:$0xff] %v1766_v53 }
 0x86f   :  { %2554 = shalt.err (!%p2551_p9)
}
 0x870   :  { %1788 = dma.vmem_to_hbm [thread:$0]  %s1786_s7, 128, %s3046_s20, [#allocation27]  }
 0x871   :  { %2579 = dma.done.wait [#allocation4], 128  }
 0x872   :  { %2580 = vsyncadd [#allocation4], 4294967168 }
 0x873   :  { %2581 = dma.done.wait [#allocation27], 128  }
 0x874   :  { %2582 = vsyncadd [#allocation27], 4294967168 }
 0x875   :  { %1795 = vsyncpa [#allocation3], 1 }
 0x876   :  { %1796 = vsyncpa [#allocation6], 1 }
 0x877   :  { %1797 = vsyncpa [#allocation9], 1 }
 0x878   :  { %1798 = vsyncpa [#allocation12], 1 }
 0x879   :  { %1799 = vsyncpa [#allocation15], 1 }
 0x87a   :  { %1800 = vsyncpa [#allocation18], 1 }
 0x87b   :  { %1801 = vsyncpa [#allocation21], 1 }
 0x87c   :  { %1802 = vsyncpa [#allocation24], 1 }
 0x87d   :  { %1803 = vsyncpa [#allocation4], 1 }
 0x87e   :  { %1804 = vsyncpa [#allocation27], 1 }

</bundles_post_ra>
